<compile_context>
chip_gen: v5e
topology: v5e:2x2
jax: 0.10.0
libtpu: 0.0.40
codegen_flags: <defaults>
</compile_context>

<pallas_src>
import itertools

import jax
import jax.numpy as jnp
import numpy as np
from jax.experimental import pallas as pl
from jax.experimental.pallas import tpu as pltpu


# ---------------------------------------------------------------------------
# Hardware-aware helpers
# ---------------------------------------------------------------------------
def _round_up(n, m):
    return m * ((n + m - 1) // m)


def _pad_to(x, target_shape):
    pads = [(0, t - s) for s, t in zip(x.shape, target_shape)]
    if all(p == (0, 0) for p in pads):
        return x
    return jnp.pad(x, pads)


def _tpu_generation():
    try:
        kind = jax.devices()[0].device_kind.lower()
    except Exception:
        return 6
    for g in (7, 6, 5, 4):
        if f"v{g}" in kind:
            return g
    return 6


def _vmem_limit_bytes():
    # ~3/4 of physical VMEM: ~96 MiB on v5e/v6e (128 MiB), ~48 MiB on v7x (64 MiB).
    cap = None
    try:
        cap = int(pltpu.get_tpu_info().vmem_capacity_bytes)
    except Exception:
        cap = None
    if cap is None:
        cap = (64 if _tpu_generation() >= 7 else 128) * 1024 * 1024
    return int(cap * 3 // 4)


def _pick_batch_tile(batch):
    # tb = min(next_multiple_of_128(B), 128); 256 on v6e/v7x when B can fill it.
    tb = min(_round_up(max(batch, 1), 128), 128)
    if _tpu_generation() >= 6 and batch >= 256:
        tb = 256
    return tb


def _pick_tile(total, candidates):
    for c in candidates:
        if total % c == 0:
            return c
    return total


# Constant-index operands: request single buffering (they are never re-fetched,
# so double-buffering only doubles their VMEM footprint). Fall back gracefully
# if pipeline_mode=pl.Buffered(1) is rejected by the installed JAX.
_BUFFERED_CONST = [True]


def _const_spec(shape, buffered):
    index_map = lambda *_: (0,) * len(shape)
    if buffered and hasattr(pl, "Buffered"):
        return pl.BlockSpec(shape, index_map, pipeline_mode=pl.Buffered(1))
    return pl.BlockSpec(shape, index_map)


# ---------------------------------------------------------------------------
# Kernel 1: pair composition (tiled over pairs, fused K=2E matmul,
# emits transposed bf16 (E, P_pad) directly)
#   pair = L2_normalize([attr_emb || obj_emb] @ Wp + bp, axis=-1)
# (== torch: F.normalize(projection(cat([attr_emb, obj_emb], 1)), dim=1))
# ---------------------------------------------------------------------------
def _compose_kernel(ao_ref, wp_ref, bp_ref, outT_ref):
    p = jnp.dot(ao_ref[...], wp_ref[...], preferred_element_type=jnp.float32)
    p = p + bp_ref[...]
    # Matches F.normalize up to eps handling (rsqrt(sum_sq + 1e-24) vs norm
    # clamped at 1e-12); identical except for exactly-zero vectors.
    inv_norm = jax.lax.rsqrt(jnp.sum(p * p, axis=-1, keepdims=True) + 1e-24)
    pn = p * inv_norm
    outT_ref[...] = jnp.transpose(pn).astype(outT_ref.dtype)


def compose_pairs_transposed(ao, wp, bp):
    """ao: (P_pad, 2E) bf16, wp: (2E, E) bf16, bp: (1, E) f32.
    Returns L2-normalized pair embeddings, transposed, bf16: (E, P_pad)."""
    P_pad, twoE = ao.shape
    E = wp.shape[1]
    assert P_pad % 128 == 0 and E % 128 == 0
    tp = _pick_tile(P_pad, (512, 256, 128))
    grid = (P_pad // tp,)

    def run(buffered):
        return pl.pallas_call(
            _compose_kernel,
            out_shape=jax.ShapeDtypeStruct((E, P_pad), jnp.bfloat16),
            grid_spec=pl.GridSpec(
                grid=grid,
                in_specs=[
                    pl.BlockSpec((tp, twoE), lambda j: (j, 0)),   # attr||obj tile
                    _const_spec((twoE, E), buffered),             # proj weight
                    _const_spec((1, E), buffered),                # proj bias
                ],
                out_specs=pl.BlockSpec((E, tp), lambda j: (0, j)),
            ),
            compiler_params=pltpu.CompilerParams(
                dimension_semantics=("parallel",),
                vmem_limit_bytes=_vmem_limit_bytes()),
        )(ao, wp, bp)

    if _BUFFERED_CONST[0]:
        try:
            return run(True)
        except Exception:
            _BUFFERED_CONST[0] = False
    return run(False)


# ---------------------------------------------------------------------------
# Kernel 2: batch x pair tiled image scoring
#   (once per batch tile) h  = relu(img @ W1 + b1)
#                         f  = relu(h   @ W2 + b2)      (image_embedder, relu=True)
#                         fn = f / ||f||                (kept in VMEM scratch)
#   (per pair tile)       score = fn @ pairT_tile       (cosine scores)
# ---------------------------------------------------------------------------
def _score_kernel(img_ref, w1_ref, b1_ref, w2_ref, b2_ref, pairT_ref,
                  out_ref, fn_ref):
    @pl.when(pl.program_id(1) == 0)
    def _():
        h = jnp.dot(img_ref[...], w1_ref[...], preferred_element_type=jnp.float32)
        h = jnp.maximum(h + b1_ref[...], 0.0)
        f = jnp.dot(h.astype(jnp.bfloat16), w2_ref[...],
                    preferred_element_type=jnp.float32)
        f = jnp.maximum(f + b2_ref[...], 0.0)
        inv_norm = jax.lax.rsqrt(jnp.sum(f * f, axis=-1, keepdims=True) + 1e-24)
        fn_ref[...] = (f * inv_norm).astype(jnp.bfloat16)

    out_ref[...] = jnp.dot(fn_ref[...], pairT_ref[...],
                           preferred_element_type=jnp.float32)


def compcos_scores(img, w1, b1, w2, b2, pairT, *, batch_tile=None, pair_tile=None):
    """Returns the (B, P_pad) cosine score matrix (padded pair columns included)."""
    B, D = img.shape
    H = w1.shape[1]
    E = w2.shape[1]
    Ep, P_pad = pairT.shape
    assert Ep == E and P_pad % 128 == 0

    tb = batch_tile or _pick_batch_tile(B)
    Bp = _round_up(B, tb)
    tn = pair_tile or _pick_tile(P_pad, (2048, 1024, 512, 256, 128))

    img_b = _pad_to(img, (Bp, D)).astype(jnp.bfloat16)
    w1_b = w1.astype(jnp.bfloat16)
    w2_b = w2.astype(jnp.bfloat16)
    b1_f = b1.reshape(1, H).astype(jnp.float32)
    b2_f = b2.reshape(1, E).astype(jnp.float32)

    grid = (Bp // tb, P_pad // tn)

    def run(buffered):
        return pl.pallas_call(
            _score_kernel,
            out_shape=jax.ShapeDtypeStruct((Bp, P_pad), jnp.float32),
            grid_spec=pltpu.PrefetchScalarGridSpec(
                num_scalar_prefetch=0,
                grid=grid,
                in_specs=[
                    pl.BlockSpec((tb, D), lambda i, j: (i, 0)),   # img tile (streams)
                    _const_spec((D, H), buffered),                # W1 (VMEM-resident)
                    _const_spec((1, H), buffered),                # b1
                    _const_spec((H, E), buffered),                # W2
                    _const_spec((1, E), buffered),                # b2
                    pl.BlockSpec((E, tn), lambda i, j: (0, j)),   # pair_embeds^T tile
                ],
                out_specs=pl.BlockSpec((tb, tn), lambda i, j: (i, j)),
                scratch_shapes=[pltpu.VMEM((tb, E), jnp.bfloat16)],  # normalized feats
            ),
            compiler_params=pltpu.CompilerParams(
                # batch axis parallel (TC sharding); pair axis arbitrary because
                # the fn scratch is carried across pair tiles.
                dimension_semantics=("parallel", "arbitrary"),
                vmem_limit_bytes=_vmem_limit_bytes()),
        )(img_b, w1_b, b1_f, w2_b, b2_f, pairT)

    if _BUFFERED_CONST[0]:
        try:
            return run(True)[:B]
        except Exception:
            _BUFFERED_CONST[0] = False
    return run(False)[:B]


# ---------------------------------------------------------------------------
# CompCos wrapper (closed-world)
# ---------------------------------------------------------------------------
class CompCosPallas:
    """JAX/Pallas port of CompCos.forward (closed-world)."""

    def __init__(self, params, attrs, objs, pairs, *, scale=20.0,
                 batch_tile=None, pair_tile=None):
        self.params = params
        self.attrs = attrs
        self.objs = objs
        self.pairs = pairs
        self.scale = scale
        self.batch_tile = batch_tile
        self.pair_tile = pair_tile
        self.training = False

        attr2idx = {a: i for i, a in enumerate(attrs)}
        obj2idx = {o: i for i, o in enumerate(objs)}
        self.val_attrs = jnp.array([attr2idx[a] for a, _ in pairs], jnp.int32)
        self.val_objs = jnp.array([obj2idx[o] for _, o in pairs], jnp.int32)
        self.pair2idx = {p: i for i, p in enumerate(pairs)}
        self.num_pairs = len(pairs)
        self._pairT = None   # cached (Ep, P_pad) bf16 normalized pair embeddings

    # ----- pair embeddings (compose), cached across eval forwards ----------
    def refresh_pair_embeddings(self):
        """(Re)build normalized pair embeddings. Call after attr/obj/projection
        params change (done automatically on every training forward)."""
        p = self.params
        E = p["obj_emb"].shape[1]
        Ep = _round_up(E, 128)
        P = self.num_pairs
        P_pad = _round_up(P, 128)
        # NOTE: padded pair rows gather attr[0]/obj[0] (real embeddings); they
        # only produce extra score columns that the wrapper slices off — never
        # reduce over the padded pair width.
        ai = jnp.zeros((P_pad,), jnp.int32).at[:P].set(self.val_attrs)
        oi = jnp.zeros((P_pad,), jnp.int32).at[:P].set(self.val_objs)
        a = _pad_to(jnp.take(p["attr_emb"], ai, axis=0), (P_pad, Ep))
        o = _pad_to(jnp.take(p["obj_emb"], oi, axis=0), (P_pad, Ep))
        ao = jnp.concatenate([a, o], axis=1).astype(jnp.bfloat16)     # (P_pad, 2Ep)
        wpa = _pad_to(p["proj_w"][:E], (Ep, Ep))
        wpo = _pad_to(p["proj_w"][E:], (Ep, Ep))
        wp = jnp.concatenate([wpa, wpo], axis=0).astype(jnp.bfloat16)  # (2Ep, Ep)
        bp = _pad_to(p["proj_b"].reshape(1, E), (1, Ep)).astype(jnp.float32)
        self._pairT = compose_pairs_transposed(ao, wp, bp)            # (Ep, P_pad)
        return self._pairT

    def _score_matrix(self, img):
        p = self.params
        pairT = self._pairT if self._pairT is not None else self.refresh_pair_embeddings()
        D = img.shape[1]
        H = p["w1"].shape[1]
        E = p["w2"].shape[1]
        Dp, Hp, Ep = _round_up(D, 128), _round_up(H, 128), _round_up(E, 128)
        # Zero-padding feature dims is exactly semantics-preserving (zero columns
        # change neither the matmuls nor the L2 norms); keeps everything lane-dense.
        img_p = _pad_to(img, (img.shape[0], Dp))
        w1 = _pad_to(p["w1"], (Dp, Hp))
        b1 = _pad_to(p["b1"].reshape(1, H), (1, Hp))
        w2 = _pad_to(p["w2"], (Hp, Ep))
        b2 = _pad_to(p["b2"].reshape(1, E), (1, Ep))
        scores = compcos_scores(img_p, w1, b1, w2, b2, pairT,
                                batch_tile=self.batch_tile, pair_tile=self.pair_tile)
        return scores[:, :self.num_pairs]

    # ----- forwards ---------------------------------------------------------
    def val_forward(self, x):
        img = x[0]
        score = self._score_matrix(img)
        # Single device->host transfer; per-pair dict built on host (avoids
        # thousands of tiny device slices per forward).
        score_host = np.asarray(jax.device_get(score))
        scores = {pair: score_host[:, self.pair2idx[pair]] for pair in self.pairs}
        return None, scores

    def train_forward_closed(self, x):
        img, _, _, pair_labels = x[0], x[1], x[2], x[3]
        self.refresh_pair_embeddings()          # params may have changed
        pair_pred = self._score_matrix(img)
        logits = self.scale * pair_pred
        logz = jax.nn.logsumexp(logits, axis=-1)
        picked = jnp.take_along_axis(logits, pair_labels[:, None], axis=1)[:, 0]
        loss = jnp.mean(logz - picked)           # F.cross_entropy
        return loss, None

    def __call__(self, x):
        if self.training:
            return self.train_forward_closed(x)
        return self.val_forward(x)


# ---------------------------------------------------------------------------
# Pure-JAX f32 reference (torch semantics) and demo
# ---------------------------------------------------------------------------
def _reference_scores(params, img, val_attrs, val_objs):
    a = params["attr_emb"][val_attrs]
    o = params["obj_emb"][val_objs]
    pr = jnp.concatenate([a, o], axis=1) @ params["proj_w"] + params["proj_b"]
    pr = pr / jnp.maximum(jnp.linalg.norm(pr, axis=1, keepdims=True), 1e-12)
    h = jnp.maximum(img @ params["w1"] + params["b1"], 0.0)
    f = jnp.maximum(h @ params["w2"] + params["b2"], 0.0)
    fn = f / jnp.maximum(jnp.linalg.norm(f, axis=1, keepdims=True), 1e-12)
    return fn @ pr.T


def _make_params(key, D, H, E, NA, NO):
    ks = jax.random.split(key, 8)
    return {
        "w1": jax.random.normal(ks[0], (D, H), jnp.float32) / jnp.sqrt(D),
        "b1": jax.random.normal(ks[1], (H,), jnp.float32) * 0.01,
        "w2": jax.random.normal(ks[2], (H, E), jnp.float32) / jnp.sqrt(H),
        "b2": jax.random.normal(ks[3], (E,), jnp.float32) * 0.01,
        "attr_emb": jax.random.normal(ks[4], (NA, E), jnp.float32),
        "obj_emb": jax.random.normal(ks[5], (NO, E), jnp.float32),
        "proj_w": jax.random.normal(ks[6], (2 * E, E), jnp.float32) / jnp.sqrt(2 * E),
        "proj_b": jax.random.normal(ks[7], (E,), jnp.float32) * 0.01,
    }


if __name__ == "__main__":
    def check(seed, B, D, H, E, NA, NO, P):
        attrs = [f"attr{i}" for i in range(NA)]
        objs = [f"obj{i}" for i in range(NO)]
        pairs = list(itertools.product(attrs, objs))[:P]

        params = _make_params(jax.random.PRNGKey(seed), D, H, E, NA, NO)
        img = jax.random.normal(jax.random.PRNGKey(seed + 100), (B, D), jnp.float32)

        model = CompCosPallas(params, attrs, objs, pairs, scale=20.0)

        # --- eval forward (val_forward path) ------------------------------
        model.training = False
        loss, scores = model((img,))
        score_mat = jnp.stack([jnp.asarray(scores[p]) for p in pairs], axis=1)
        jax.block_until_ready(score_mat)
        assert loss is None and score_mat.shape == (B, P)

        ref = _reference_scores(params, img, model.val_attrs, model.val_objs)
        assert jnp.all(jnp.isfinite(score_mat))
        # bf16 MXU operands vs f32 reference: loose abs tolerance on cosine scores.
        err = float(jnp.max(jnp.abs(score_mat - ref)))
        assert err < 3e-2, err

        # --- closed-world training forward (cross-entropy on kernel scores) ---
        model.training = True
        labels = jax.random.randint(jax.random.PRNGKey(seed + 200), (B,), 0, P,
                                    jnp.int32)
        train_loss, _ = model((img, None, None, labels))
        jax.block_until_ready(train_loss)
        assert jnp.isfinite(train_loss)

    # Small, lane-aligned shapes: batch=16, feat=hidden=emb=128, 16 pairs.
    check(0, B=16, D=128, H=128, E=128, NA=8, NO=8, P=16)
    # Non-128-aligned shapes: exercises the zero-padding path (word-vector-like dims).
    check(1, B=5, D=96, H=72, E=80, NA=6, NO=5, P=13)

    print("KERNEL_OK")
</pallas_src>

<mosaic_0001>
module attributes {stable_mosaic.version = 11 : i64} {
  func.func @_compose_kernel(%arg0: i32, %arg1: memref<128x256xbf16, #tpu.memory_space<vmem>>, %arg2: memref<256x128xbf16, #tpu.memory_space<vmem>>, %arg3: memref<1x128xf32, #tpu.memory_space<vmem>>, %arg4: memref<128x128xbf16, #tpu.memory_space<vmem>>) attributes {dimension_semantics = [#tpu.dimension_semantics<parallel>], iteration_bounds = array<i64: 1>, scalar_prefetch = 0 : i64, scratch_operands = 0 : i64, tpu.core_type = #tpu.core_type<tc>, window_params = [{transform_indices = @transform_0, window_bounds = array<i64: 128, 256>}, {pipeline_mode = #tpu.pipeline_mode<synchronous>, transform_indices = @transform_1, window_bounds = array<i64: 256, 128>}, {pipeline_mode = #tpu.pipeline_mode<synchronous>, transform_indices = @transform_2, window_bounds = array<i64: 1, 128>}, {transform_indices = @transform_3, window_bounds = array<i64: 128, 128>}]} {
    %c0 = arith.constant 0 : index
    %c0_0 = arith.constant 0 : index
    %0 = vector.load %arg1[%c0, %c0_0] : memref<128x256xbf16, #tpu.memory_space<vmem>>, vector<128x256xbf16>
    %c0_1 = arith.constant 0 : index
    %c0_2 = arith.constant 0 : index
    %1 = vector.load %arg2[%c0_1, %c0_2] : memref<256x128xbf16, #tpu.memory_space<vmem>>, vector<256x128xbf16>
    %cst = arith.constant dense<0.000000e+00> : vector<128x128xf32>
    %2 = tpu.matmul %0, %1, %cst {dimension_numbers = #tpu.dot_dimension_numbers<[1], [0], [0], [1], [0, 0, 1, 1], [], []>} : vector<128x256xbf16>, vector<256x128xbf16>, vector<128x128xf32> -> vector<128x128xf32>
    %c0_3 = arith.constant 0 : index
    %c0_4 = arith.constant 0 : index
    %3 = vector.load %arg3[%c0_3, %c0_4] : memref<1x128xf32, #tpu.memory_space<vmem>>, vector<1x128xf32>
    %4 = vector.broadcast %3 : vector<1x128xf32> to vector<128x128xf32>
    %5 = arith.addf %2, %4 : vector<128x128xf32>
    %6 = arith.mulf %5, %5 : vector<128x128xf32>
    %cst_5 = arith.constant dense<0.000000e+00> : vector<128xf32>
    %7 = vector.multi_reduction <add>, %6, %cst_5 [1] : vector<128x128xf32> to vector<128xf32>
    %8 = vector.shape_cast %7 : vector<128xf32> to vector<128x1xf32>
    %cst_6 = arith.constant 1.000000e-24 : f32
    %9 = vector.broadcast %cst_6 : f32 to vector<128x1xf32>
    %10 = arith.addf %8, %9 : vector<128x1xf32>
    %11 = math.rsqrt %10 : vector<128x1xf32>
    %12 = vector.broadcast %11 : vector<128x1xf32> to vector<128x128xf32>
    %13 = arith.mulf %5, %12 : vector<128x128xf32>
    %14 = tpu.transpose %13, [1, 0] : vector<128x128xf32> -> vector<128x128xf32>
    %15 = arith.truncf %14 : vector<128x128xf32> to vector<128x128xbf16>
    %c0_7 = arith.constant 0 : index
    %c0_8 = arith.constant 0 : index
    %16 = vector.load %arg4[%c0_7, %c0_8] : memref<128x128xbf16, #tpu.memory_space<vmem>>, vector<128x128xbf16>
    tpu.vector_store %arg4[%c0_7, %c0_8], %15 {strides = array<i32>} : memref<128x128xbf16, #tpu.memory_space<vmem>>, vector<128x128xbf16>,
    return
  }
  func.func @transform_0(%arg0: i32) -> (i32, i32) {
    %c0_i32 = arith.constant 0 : i32
    %c0_i32_0 = arith.constant 0 : i32
    return %arg0, %c0_i32 : i32, i32
  }
  func.func @transform_1(%arg0: i32) -> (i32, i32) {
    %c0_i32 = arith.constant 0 : i32
    %c0_i32_0 = arith.constant 0 : i32
    %c0_i32_1 = arith.constant 0 : i32
    return %c0_i32, %c0_i32_0 : i32, i32
  }
  func.func @transform_2(%arg0: i32) -> (i32, i32) {
    %c0_i32 = arith.constant 0 : i32
    %c0_i32_0 = arith.constant 0 : i32
    %c0_i32_1 = arith.constant 0 : i32
    return %c0_i32, %c0_i32_0 : i32, i32
  }
  func.func @transform_3(%arg0: i32) -> (i32, i32) {
    %c0_i32 = arith.constant 0 : i32
    %c0_i32_0 = arith.constant 0 : i32
    return %c0_i32, %arg0 : i32, i32
  }
}

module attributes {stable_mosaic.version = 11 : i64} {
  func.func @_compose_kernel(%arg0: i32, %arg1: memref<128x256xbf16, #tpu.memory_space<vmem>>, %arg2: memref<256x128xbf16, #tpu.memory_space<vmem>>, %arg3: memref<1x128xf32, #tpu.memory_space<vmem>>, %arg4: memref<128x128xbf16, #tpu.memory_space<vmem>>) attributes {dimension_semantics = [#tpu.dimension_semantics<parallel>], iteration_bounds = array<i64: 1>, scalar_prefetch = 0 : i64, scratch_operands = 0 : i64, tpu.core_type = #tpu.core_type<tc>, window_params = [{transform_indices = @transform_0, window_bounds = array<i64: 128, 256>}, {pipeline_mode = #tpu.pipeline_mode<synchronous>, transform_indices = @transform_1, window_bounds = array<i64: 256, 128>}, {pipeline_mode = #tpu.pipeline_mode<synchronous>, transform_indices = @transform_2, window_bounds = array<i64: 1, 128>}, {transform_indices = @transform_3, window_bounds = array<i64: 128, 128>}]} {
    %c0 = arith.constant 0 : index
    %c0_0 = arith.constant 0 : index
    %0 = vector.load %arg1[%c0, %c0_0] : memref<128x256xbf16, #tpu.memory_space<vmem>>, vector<128x256xbf16>
    %c0_1 = arith.constant 0 : index
    %c0_2 = arith.constant 0 : index
    %1 = vector.load %arg2[%c0_1, %c0_2] : memref<256x128xbf16, #tpu.memory_space<vmem>>, vector<256x128xbf16>
    %cst = arith.constant dense<0.000000e+00> : vector<128x128xf32>
    %2 = tpu.matmul %0, %1, %cst {dimension_numbers = #tpu.dot_dimension_numbers<[1], [0], [0], [1], [0, 0, 1, 1], [], []>} : vector<128x256xbf16>, vector<256x128xbf16>, vector<128x128xf32> -> vector<128x128xf32>
    %c0_3 = arith.constant 0 : index
    %c0_4 = arith.constant 0 : index
    %3 = vector.load %arg3[%c0_3, %c0_4] : memref<1x128xf32, #tpu.memory_space<vmem>>, vector<1x128xf32>
    %4 = vector.broadcast %3 : vector<1x128xf32> to vector<128x128xf32>
    %5 = arith.addf %2, %4 : vector<128x128xf32>
    %6 = arith.mulf %5, %5 : vector<128x128xf32>
    %cst_5 = arith.constant dense<0.000000e+00> : vector<128xf32>
    %7 = vector.multi_reduction <add>, %6, %cst_5 [1] : vector<128x128xf32> to vector<128xf32>
    %8 = vector.shape_cast %7 : vector<128xf32> to vector<128x1xf32>
    %cst_6 = arith.constant 1.000000e-24 : f32
    %9 = vector.broadcast %cst_6 : f32 to vector<128x1xf32>
    %10 = arith.addf %8, %9 : vector<128x1xf32>
    %11 = math.rsqrt %10 : vector<128x1xf32>
    %12 = vector.broadcast %11 : vector<128x1xf32> to vector<128x128xf32>
    %13 = arith.mulf %5, %12 : vector<128x128xf32>
    %14 = tpu.transpose %13, [1, 0] : vector<128x128xf32> -> vector<128x128xf32>
    %15 = arith.truncf %14 : vector<128x128xf32> to vector<128x128xbf16>
    %c0_7 = arith.constant 0 : index
    %c0_8 = arith.constant 0 : index
    %16 = vector.load %arg4[%c0_7, %c0_8] : memref<128x128xbf16, #tpu.memory_space<vmem>>, vector<128x128xbf16>
    tpu.vector_store %arg4[%c0_7, %c0_8], %15 {strides = array<i32>} : memref<128x128xbf16, #tpu.memory_space<vmem>>, vector<128x128xbf16>,
    return
  }
  func.func @transform_0(%arg0: i32) -> (i32, i32) {
    %c0_i32 = arith.constant 0 : i32
    %c0_i32_0 = arith.constant 0 : i32
    return %arg0, %c0_i32 : i32, i32
  }
  func.func @transform_1(%arg0: i32) -> (i32, i32) {
    %c0_i32 = arith.constant 0 : i32
    %c0_i32_0 = arith.constant 0 : i32
    %c0_i32_1 = arith.constant 0 : i32
    return %c0_i32, %c0_i32_0 : i32, i32
  }
  func.func @transform_2(%arg0: i32) -> (i32, i32) {
    %c0_i32 = arith.constant 0 : i32
    %c0_i32_0 = arith.constant 0 : i32
    %c0_i32_1 = arith.constant 0 : i32
    return %c0_i32, %c0_i32_0 : i32, i32
  }
  func.func @transform_3(%arg0: i32) -> (i32, i32) {
    %c0_i32 = arith.constant 0 : i32
    %c0_i32_0 = arith.constant 0 : i32
    return %c0_i32, %arg0 : i32, i32
  }
}

</mosaic_0001>

<bundles_post_ra>
// kernel: tpu_custom_call.1
= control target key start
LH: loop header
LB: loop body
LE: loop exit
PB: predicated region body
PF: predicated region fallthrough
CT: control target
= control target key end

     0   :  { %8 = vsyncpa [#allocation3], 0  ;;  %s1199_s0 = inlined_call_operand.hbm [shape: bf16[128,256], index: 0, kind: input, shape index: {}]   ;;  %s1200_s1 = inlined_call_operand.hbm [shape: bf16[256,128], index: 1, kind: input, shape index: {}]   ;;  %s1201_s2 = inlined_call_operand.vmem [shape: f32[1,128], index: 2, kind: input, shape index: {}]   ;;  %s1202_s3 = inlined_call_operand.hbm [shape: bf16[128,128], index: 3, kind: output, shape index: {}]  }
   0x1   :  { %9 = vsyncpa [#allocation6], 0 }
   0x2   :  { %10 = vsyncpa [#allocation4], 0  ;;  %s15_s14 = sshll.u32 %s1199_s0, 4  ;;  %s1038_s15 = smov [#allocation2]   ;;  %s16_s14 = int_to_ptr.hbm [resolvable:$true] %s15_s14 }
   0x3   :  { %s17_s16 = sshll.u32 %s1038_s15, 4  ;;  %s28_s19 = sshll.u32 %s1200_s1, 4  ;;  %s18_s16 = int_to_ptr.vmem [resolvable:$true] %s17_s16  ;;  %s29_s19 = int_to_ptr.hbm [resolvable:$true] %s28_s19 }
   0x4   :  { %s1039_s20 = smov 128   ;;  %s1040_s21 = smov 8  }
   0x5   :  { %23 = dma.hbm_to_vmem [thread:$0]  %s16_s14, 2048, %s18_s16, [#allocation3], %s1039_s20, %s1039_s20, %s1040_s21  }
   0x6   :  { %s1041_s22 = smov [#allocation5]   ;;  %s1042_s24 = smov 64  }
   0x7   :  { %s30_s23 = sshll.u32 %s1041_s22, 4  ;;  %s1043_s25 = smov 4   ;;  %s31_s23 = int_to_ptr.vmem [resolvable:$true] %s30_s23 }
   0x8   :  { %36 = dma.hbm_to_vmem [thread:$0]  %s29_s19, 2048, %s31_s23, [#allocation6], %s1042_s24, %s1042_s24, %s1043_s25  }
   0x9   :  { %1032 = dma.done.wait [#allocation3], 2048  }
   0xa   :  { %1033 = vsyncadd [#allocation3], 4294965248 }
   0xb   :  { %1034 = dma.done.wait [#allocation6], 2048  }
   0xc   :  { %1035 = vsyncadd [#allocation6], 4294965248  ;;  %v848_v0 = vld [vmem:[#allocation5 + $0x38] sm:$0xff]  ;;  %v847_v2 = vld [vmem:[#allocation5 + $0x30] sm:$0xff]  ;;  %s683_s29 = sshll.u32 %s1202_s3, 4  ;;  %s684_s29 = int_to_ptr.hbm [resolvable:$true] %s683_s29 }
   0xd   :  { %v856_v1 = vld [vmem:[#allocation5 + $0x78] sm:$0xff]  ;;  %275 = vmatpush.bf16.msra.mxu0 %v848_v0  ;;  %904 = vmatpush.bf16.msra.mxu2 %v848_v0  ;;  %v855_v3 = vld [vmem:[#allocation5 + $0x70] sm:$0xff]  ;;  %v846_v4 = vld [vmem:[#allocation5 + $0x28] sm:$0xff] }
   0xe   :  { %324 = vmatpush.bf16.msra.mxu1 %v856_v1  ;;  %912 = vmatpush.bf16.msra.mxu3 %v856_v1  ;;  %v854_v5 = vld [vmem:[#allocation5 + $0x68] sm:$0xff]  ;;  %v845_v6 = vld [vmem:[#allocation5 + $0x20] sm:$0xff]  ;;  %v844_v8 = vld [vmem:[#allocation5 + $0x18] sm:$0xff] }
   0xf   :  { %v853_v7 = vld [vmem:[#allocation5 + $0x60] sm:$0xff]  ;;  %v852_v9 = vld [vmem:[#allocation5 + $0x58] sm:$0xff]  ;;  %v843_v10 = vld [vmem:[#allocation5 + $0x10] sm:$0xff] }
  0x10   :  { %v851_v11 = vld [vmem:[#allocation5 + $0x50] sm:$0xff]  ;;  %v842_v12 = vld [vmem:[#allocation5 + $0x8] sm:$0xff]  ;;  %v841_v14 = vld [vmem:[#allocation5] sm:$0xff] }
  0x11   :  { %276 = vmatpush.bf16.msra.mxu0 %v847_v2  ;;  %905 = vmatpush.bf16.msra.mxu2 %v847_v2  ;;  %v850_v13 = vld [vmem:[#allocation5 + $0x48] sm:$0xff]  ;;  %v849_v15 = vld [vmem:[#allocation5 + $0x40] sm:$0xff]  ;;  %v707_v28 = vld [vmem:[#allocation2 + $0x10] sm:$0xf] }
  0x12   :  { %325 = vmatpush.bf16.msra.mxu1 %v855_v3  ;;  %913 = vmatpush.bf16.msra.mxu3 %v855_v3  ;;  %v699_v16 = vld [vmem:[#allocation2] sm:$0xf]  ;;  %v826_v17 = vld [vmem:[#allocation2 + $0x4] sm:$0xf0]  ;;  %v825_v20 = vld [vmem:[#allocation2 + $0x4] sm:$0xf] }
  0x13   :  { %v731_v18 = vld [vmem:[#allocation2 + $0x40] sm:$0xf]  ;;  %v834_v19 = vld [vmem:[#allocation2 + $0x44] sm:$0xf0]  ;;  %v701_v21 = vld [vmem:[#allocation2 + $0x8] sm:$0xf0]  ;;  %v700_v24 = vor.u32 %v826_v17, %v699_v16 }
  0x14   :  { %v833_v22 = vld [vmem:[#allocation2 + $0x44] sm:$0xf]  ;;  %v733_v23 = vld [vmem:[#allocation2 + $0x48] sm:$0xf0]  ;;  %v732_v25 = vor.u32 %v834_v19, %v731_v18  ;;  %v704_v26 = vor.u32 %v825_v20, %v701_v21  ;;  %v828_v29 = vld [vmem:[#allocation2 + $0x14] sm:$0xf0] }
  0x15   :  { %277 = vmatpush.bf16.msra.mxu0 %v846_v4  ;;  %906 = vmatpush.bf16.msra.mxu2 %v846_v4  ;;  %v736_v27 = vor.u32 %v833_v22, %v733_v23  ;;  %v739_v30 = vld [vmem:[#allocation2 + $0x50] sm:$0xf]  ;;  %v836_v31 = vld [vmem:[#allocation2 + $0x54] sm:$0xf0]  ;;  %v827_v32 = vld [vmem:[#allocation2 + $0x14] sm:$0xf]  ;;  %v708_v36 = vor.u32 %v828_v29, %v707_v28 }
  0x16   :  { %326 = vmatpush.bf16.msra.mxu1 %v854_v5  ;;  %914 = vmatpush.bf16.msra.mxu3 %v854_v5  ;;  %v709_v33 = vld [vmem:[#allocation2 + $0x18] sm:$0xf0]  ;;  %v835_v34 = vld [vmem:[#allocation2 + $0x54] sm:$0xf]  ;;  %v740_v37 = vor.u32 %v836_v31, %v739_v30  ;;  %v715_v40 = vld [vmem:[#allocation2 + $0x20] sm:$0xf] }
  0x17   :  { %v741_v35 = vld [vmem:[#allocation2 + $0x58] sm:$0xf0]  ;;  %v712_v38 = vor.u32 %v827_v32, %v709_v33  ;;  %v830_v41 = vld [vmem:[#allocation2 + $0x24] sm:$0xf0]  ;;  %v747_v42 = vld [vmem:[#allocation2 + $0x60] sm:$0xf] }
  0x18   :  { %v744_v39 = vor.u32 %v835_v34, %v741_v35  ;;  %v838_v43 = vld [vmem:[#allocation2 + $0x64] sm:$0xf0]  ;;  %v829_v44 = vld [vmem:[#allocation2 + $0x24] sm:$0xf]  ;;  %v717_v45 = vld [vmem:[#allocation2 + $0x28] sm:$0xf0]  ;;  %v716_v48 = vor.u32 %v830_v41, %v715_v40 }
  0x19   :  { %278 = vmatpush.bf16.msra.mxu0 %v845_v6  ;;  %907 = vmatpush.bf16.msra.mxu2 %v845_v6  ;;  %v837_v46 = vld [vmem:[#allocation2 + $0x64] sm:$0xf]  ;;  %v749_v47 = vld [vmem:[#allocation2 + $0x68] sm:$0xf0]  ;;  %v748_v49 = vor.u32 %v838_v43, %v747_v42  ;;  %v720_v50 = vor.u32 %v829_v44, %v717_v45  ;;  %v723_v52 = vld [vmem:[#allocation2 + $0x30] sm:$0xf] }
  0x1a   :  { %327 = vmatpush.bf16.msra.mxu1 %v853_v7  ;;  %915 = vmatpush.bf16.msra.mxu3 %v853_v7  ;;  %v752_v51 = vor.u32 %v837_v46, %v749_v47  ;;  %v832_v53 = vld [vmem:[#allocation2 + $0x34] sm:$0xf0]  ;;  %v831_v54 = vld [vmem:[#allocation2 + $0x34] sm:$0xf]  ;;  %v755_v55 = vld [vmem:[#allocation2 + $0x70] sm:$0xf] }
  0x1b   :  { %v840_v56 = vld [vmem:[#allocation2 + $0x74] sm:$0xf0]  ;;  %v725_v57 = vld [vmem:[#allocation2 + $0x38] sm:$0xf0]  ;;  %v839_v58 = vld [vmem:[#allocation2 + $0x74] sm:$0xf]  ;;  %v724_v60 = vor.u32 %v832_v53, %v723_v52 }
  0x1c   :  { %v757_v59 = vld [vmem:[#allocation2 + $0x78] sm:$0xf0]  ;;  %v756_v61 = vor.u32 %v840_v56, %v755_v55  ;;  %v728_v62 = vor.u32 %v831_v54, %v725_v57  ;;  %v1077_v0 = vld [vmem:[%s1201_s2] ss:$0 sm:$0xff]  ;;  %s1044_s2 = smov [#allocation7]  }
  0x1d   :  { %279 = vmatpush.bf16.msra.mxu0 %v844_v8  ;;  %908 = vmatpush.bf16.msra.mxu2 %v844_v8  ;;  %v760_v63 = vor.u32 %v839_v58, %v757_v59  ;;  %s681_s26 = sshll.u32 %s1044_s2, 4  ;;  %s682_s26 = int_to_ptr.vmem [resolvable:$true] %s681_s26 }
  0x1e   :  { %328 = vmatpush.bf16.msra.mxu1 %v852_v9  ;;  %916 = vmatpush.bf16.msra.mxu3 %v852_v9 }
  0x21   :  { %280 = vmatpush.bf16.msra.mxu0 %v843_v10  ;;  %909 = vmatpush.bf16.msra.mxu2 %v843_v10 }
  0x22   :  { %329 = vmatpush.bf16.msra.mxu1 %v851_v11  ;;  %917 = vmatpush.bf16.msra.mxu3 %v851_v11 }
  0x25   :  { %281 = vmatpush.bf16.msra.mxu0 %v842_v12  ;;  %910 = vmatpush.bf16.msra.mxu2 %v842_v12 }
  0x26   :  { %330 = vmatpush.bf16.msra.mxu1 %v850_v13  ;;  %918 = vmatpush.bf16.msra.mxu3 %v850_v13 }
  0x29   :  { %282 = vmatpush.bf16.msra.mxu0 %v841_v14  ;;  %911 = vmatpush.bf16.msra.mxu2 %v841_v14 }
  0x2a   :  { %331 = vmatpush.bf16.msra.mxu1 %v849_v15  ;;  %919 = vmatpush.bf16.msra.mxu3 %v849_v15 }
  0x2c   :  { %283 = vmatmul.bf16.vlgmr.msra.gmra.mxu0 %v700_v24  ;;  %303 = vmatmul.bf16.vlgmr.msra.gmra.mxu2 %v732_v25 }
  0x2d   :  { %332 = vmatmul.bf16.vlgmr.msra.gmra.mxu1 %v704_v26  ;;  %352 = vmatmul.bf16.vlgmr.msra.gmra.mxu3 %v736_v27 }
  0x3c   :  { %288 = vmatmul.bf16.gmra.mxu0 %v708_v36  ;;  %308 = vmatmul.bf16.gmra.mxu2 %v740_v37 }
  0x3d   :  { %337 = vmatmul.bf16.gmra.mxu1 %v712_v38  ;;  %357 = vmatmul.bf16.gmra.mxu3 %v744_v39 }
  0x4c   :  { %293 = vmatmul.bf16.gmra.mxu0 %v716_v48  ;;  %313 = vmatmul.bf16.gmra.mxu2 %v748_v49 }
  0x4d   :  { %342 = vmatmul.bf16.gmra.mxu1 %v720_v50  ;;  %362 = vmatmul.bf16.gmra.mxu3 %v752_v51 }
  0x5c   :  { %298 = vmatmul.bf16.gmra.mxu0 %v724_v60  ;;  %318 = vmatmul.bf16.gmra.mxu2 %v756_v61 }
  0x5d   :  { %347 = vmatmul.bf16.gmra.mxu1 %v728_v62  ;;  %367 = vmatmul.bf16.gmra.mxu3 %v760_v63 }
  0xa9   :  { %v284_v1 = vpop.f32.mrf.mxu0 }
  0xaa   :  { %v285_v2 = vadd.f32 %v1077_v0, %v284_v1  ;;  %v333_v3 = vpop.f32.mrf.mxu1 }
  0xac   :  { %v1080_v4 = vadd.f32 %v333_v3, %v285_v2 }
  0xae   :  { %v373_v5 = vmul.f32 %v1080_v4, %v1080_v4 }
  0xaf   :  { %v304_v6 = vpop.f32.mrf.mxu2 }
  0xb0   :  { %v353_v7 = vpop.f32.mrf.mxu3  ;;  %389 = vadd.xlane.f32.xlu0 %v373_v5  ;;  %v305_v43 = vadd.f32 %v1077_v0, %v304_v6 }
  0xb1   :  { %v286_v8 = vpop.f32.mrf.mxu0 }
  0xb2   :  { %v287_v9 = vadd.f32 %v1077_v0, %v286_v8  ;;  %v335_v10 = vpop.f32.mrf.mxu1  ;;  %v1116_v49 = vadd.f32 %v353_v7, %v305_v43 }
  0xb4   :  { %v1085_v11 = vadd.f32 %v335_v10, %v287_v9  ;;  %v381_v56 = vmul.f32 %v1116_v49, %v1116_v49 }
  0xb6   :  { %v374_v12 = vmul.f32 %v1085_v11, %v1085_v11 }
  0xb7   :  { %v306_v13 = vpop.f32.mrf.mxu2 }
  0xb8   :  { %v355_v14 = vpop.f32.mrf.mxu3  ;;  %391 = vadd.xlane.f32.xlu0 %v374_v12  ;;  %v307_v58 = vadd.f32 %v1077_v0, %v306_v13 }
  0xb9   :  { %v289_v15 = vpop.f32.mrf.mxu0 }
  0xba   :  { %v290_v16 = vadd.f32 %v1077_v0, %v289_v15  ;;  %v338_v17 = vpop.f32.mrf.mxu1  ;;  %v1134_v63 = vadd.f32 %v355_v14, %v307_v58 }
  0xbc   :  { %v1090_v18 = vadd.f32 %v338_v17, %v290_v16  ;;  %v382_v9 = vmul.f32 %v1134_v63, %v1134_v63 }
  0xbe   :  { %v375_v19 = vmul.f32 %v1090_v18, %v1090_v18 }
  0xbf   :  { %v309_v20 = vpop.f32.mrf.mxu2 }
  0xc0   :  { %v358_v21 = vpop.f32.mrf.mxu3  ;;  %393 = vadd.xlane.f32.xlu1 %v375_v19  ;;  %v310_v26 = vadd.f32 %v1077_v0, %v309_v20 }
  0xc1   :  { %v291_v22 = vpop.f32.mrf.mxu0 }
  0xc2   :  { %v292_v23 = vadd.f32 %v1077_v0, %v291_v22  ;;  %v340_v24 = vpop.f32.mrf.mxu1  ;;  %v1100_v31 = vadd.f32 %v358_v21, %v310_v26 }
  0xc4   :  { %v1095_v25 = vadd.f32 %v340_v24, %v292_v23  ;;  %v383_v36 = vmul.f32 %v1100_v31, %v1100_v31 }
  0xc6   :  { %v376_v27 = vmul.f32 %v1095_v25, %v1095_v25 }
  0xc7   :  { %v311_v28 = vpop.f32.mrf.mxu2 }
  0xc8   :  { %v360_v29 = vpop.f32.mrf.mxu3  ;;  %395 = vadd.xlane.f32.xlu1 %v376_v27  ;;  %v312_v55 = vadd.f32 %v1077_v0, %v311_v28 }
  0xc9   :  { %v294_v30 = vpop.f32.mrf.mxu0 }
  0xca   :  { %v295_v32 = vadd.f32 %v1077_v0, %v294_v30  ;;  %v343_v33 = vpop.f32.mrf.mxu1  ;;  %v1131_v61 = vadd.f32 %v360_v29, %v312_v55 }
  0xcc   :  { %v1103_v34 = vadd.f32 %v343_v33, %v295_v32  ;;  %v384_v6 = vmul.f32 %v1131_v61, %v1131_v61 }
  0xce   :  { %v377_v35 = vmul.f32 %v1103_v34, %v1103_v34 }
  0xcf   :  { %v314_v37 = vpop.f32.mrf.mxu2 }
  0xd0   :  { %v363_v38 = vpop.f32.mrf.mxu3  ;;  %397 = vadd.xlane.f32.xlu2 %v377_v35  ;;  %409 = vadd.xlane.f32.xlu1 %v383_v36  ;;  %v315_v8 = vadd.f32 %v1077_v0, %v314_v37 }
  0xd1   :  { %v296_v39 = vpop.f32.mrf.mxu0 }
  0xd2   :  { %v297_v40 = vadd.f32 %v1077_v0, %v296_v39  ;;  %v345_v41 = vpop.f32.mrf.mxu1  ;;  %v1148_v13 = vadd.f32 %v363_v38, %v315_v8 }
  0xd4   :  { %v1110_v42 = vadd.f32 %v345_v41, %v297_v40  ;;  %v385_v17 = vmul.f32 %v1148_v13, %v1148_v13 }
  0xd6   :  { %v378_v44 = vmul.f32 %v1110_v42, %v1110_v42 }
  0xd7   :  { %v316_v45 = vpop.f32.mrf.mxu2 }
  0xd8   :  { %v317_v46 = vadd.f32 %v1077_v0, %v316_v45  ;;  %399 = vadd.xlane.f32.xlu2 %v378_v44  ;;  %v365_v47 = vpop.f32.mrf.mxu3 }
  0xd9   :  { %v299_v48 = vpop.f32.mrf.mxu0 }
  0xda   :  { %v1118_v50 = vadd.f32 %v365_v47, %v317_v46  ;;  %v300_v51 = vadd.f32 %v1077_v0, %v299_v48  ;;  %v348_v52 = vpop.f32.mrf.mxu1 }
  0xdc   :  { %v1121_v53 = vadd.f32 %v348_v52, %v300_v51  ;;  %v386_v54 = vmul.f32 %v1118_v50, %v1118_v50 }
  0xde   :  { %415 = vadd.xlane.f32.xlu1 %v386_v54  ;;  %v379_v57 = vmul.f32 %v1121_v53, %v1121_v53 }
  0xdf   :  { %v319_v59 = vpop.f32.mrf.mxu2 }
  0xe0   :  { %405 = vadd.xlane.f32.xlu2 %v381_v56  ;;  %401 = vadd.xlane.f32.xlu0 %v379_v57  ;;  %v320_v3 = vadd.f32 %v1077_v0, %v319_v59  ;;  %v368_v5 = vpop.f32.mrf.mxu3 }
  0xe1   :  { %v301_v60 = vpop.f32.mrf.mxu0 }
  0xe2   :  { %v302_v62 = vadd.f32 %v1077_v0, %v301_v60  ;;  %v350_v1 = vpop.f32.mrf.mxu1  ;;  %v1146_v10 = vadd.f32 %v368_v5, %v320_v3 }
  0xe4   :  { %v1136_v2 = vadd.f32 %v350_v1, %v302_v62  ;;  %v387_v14 = vmul.f32 %v1146_v10, %v1146_v10 }
  0xe6   :  { %v380_v7 = vmul.f32 %v1136_v2, %v1136_v2 }
  0xe7   :  { %v321_v12 = vpop.f32.mrf.mxu2 }
  0xe8   :  { %411 = vadd.xlane.f32.xlu2 %v384_v6  ;;  %403 = vadd.xlane.f32.xlu1 %v380_v7  ;;  %v322_v15 = vadd.f32 %v1077_v0, %v321_v12  ;;  %v370_v16 = vpop.f32.mrf.mxu3 }
  0xe9   :  { %407 = vadd.xlane.f32.xlu0 %v382_v9 }
  0xea   :  { %v1155_v19 = vadd.f32 %v370_v16, %v322_v15 }
  0xec   :  { %v388_v20 = vmul.f32 %v1155_v19, %v1155_v19 }
  0xf0   :  { %417 = vadd.xlane.f32.xlu2 %v387_v14 }
  0xf1   :  { %413 = vadd.xlane.f32.xlu0 %v385_v17 }
  0xf9   :  { %419 = vadd.xlane.f32.xlu0 %v388_v20 }
 0x123   :  { %v390_v21 = vpop.xlane.xlu0 %389 }
 0x124   :  { %v421_v22 = vadd.f32 1e-24, %v390_v21 }
 0x126   :  { %928 = vrsqrt.f32 %v421_v22  ;;  %vm443_vm1 = vweird.f32 %v421_v22 }
 0x12b   :  { %v392_v23 = vpop.xlane.xlu0 %391 }
 0x12c   :  { %v929_v24 = vpop.eup %928  ;;  %v422_v26 = vadd.f32 1e-24, %v392_v23 }
 0x12d   :  { %v438_v27 = vmul.f32 %v929_v24, %v421_v22  ;;  %vm444_vm0 = vweird.f32 %v929_v24 }
 0x12e   :  { %930 = vrsqrt.f32 %v422_v26  ;;  %vm445_vm2 = vmor %vm443_vm1, %vm444_vm0  ;;  %vm453_vm4 = vweird.f32 %v422_v26 }
 0x12f   :  { %v439_v0 = vmul.f32 %v929_v24, %v438_v27 }
 0x131   :  { %v440_v28 = vmul.f32 0.5, %v439_v0 }
 0x133   :  { %v441_v29 = vsub.f32 1.5, %v440_v28  ;;  %v394_v30 = vpop.xlane.xlu1 %393 }
 0x134   :  { %v931_v32 = vpop.eup %930  ;;  %v423_v33 = vadd.f32 1e-24, %v394_v30 }
 0x135   :  { %v448_v35 = vmul.f32 %v931_v32, %v422_v26  ;;  %v442_v36 = vmul.f32 %v929_v24, %v441_v29  ;;  %vm454_vm3 = vweird.f32 %v931_v32 }
 0x136   :  { %932 = vrsqrt.f32 %v423_v33  ;;  %vm455_vm5 = vmor %vm453_vm4, %vm454_vm3  ;;  %vm463_vm7 = vweird.f32 %v423_v33 }
 0x137   :  { %v449_v37 = vmul.f32 %v931_v32, %v448_v35  ;;  %v446_v38 = vsel %vm445_vm2, %v929_v24, %v442_v36 }
 0x138   :  { %v597_v39 = vmul.f32 %v446_v38, %v1080_v4 }
 0x139   :  { %v450_v40 = vmul.f32 0.5, %v449_v37 }
 0x13a   :  { %613 = vxpose.xlu1.b32.start [1/16] %v597_v39, 128 }
 0x13b   :  { %v451_v41 = vsub.f32 1.5, %v450_v40  ;;  %v396_v43 = vpop.xlane.xlu1 %395 }
 0x13c   :  { %v933_v44 = vpop.eup %932  ;;  %v424_v45 = vadd.f32 1e-24, %v396_v43 }
 0x13d   :  { %v458_v46 = vmul.f32 %v933_v44, %v423_v33  ;;  %v452_v47 = vmul.f32 %v931_v32, %v451_v41  ;;  %vm464_vm6 = vweird.f32 %v933_v44 }
 0x13e   :  { %934 = vrsqrt.f32 %v424_v45  ;;  %vm465_vm8 = vmor %vm463_vm7, %vm464_vm6  ;;  %vm473_vm10 = vweird.f32 %v424_v45 }
 0x13f   :  { %v459_v48 = vmul.f32 %v933_v44, %v458_v46  ;;  %v456_v51 = vsel %vm455_vm5, %v931_v32, %v452_v47 }
 0x140   :  { %v598_v52 = vmul.f32 %v456_v51, %v1085_v11 }
 0x141   :  { %v460_v54 = vmul.f32 0.5, %v459_v48 }
 0x142   :  { %614 = vxpose.xlu1.b32.cont [2/16] %v598_v52, 128 }
 0x143   :  { %v461_v55 = vsub.f32 1.5, %v460_v54  ;;  %v398_v4 = vpop.xlane.xlu2 %397  ;;  %v410_v11 = vpop.xlane.xlu1 %409 }
 0x144   :  { %v935_v56 = vpop.eup %934  ;;  %v425_v57 = vadd.f32 1e-24, %v398_v4  ;;  %v1174_v52 = vadd.f32 1e-24, %v410_v11 }
 0x145   :  { %v468_v58 = vmul.f32 %v935_v56, %v424_v45  ;;  %v462_v59 = vmul.f32 %v933_v44, %v461_v55  ;;  %vm474_vm9 = vweird.f32 %v935_v56 }
 0x146   :  { %936 = vrsqrt.f32 %v425_v57  ;;  %vm475_vm11 = vmor %vm473_vm10, %vm474_vm9  ;;  %vm483_vm13 = vweird.f32 %v425_v57 }
 0x147   :  { %v469_v60 = vmul.f32 %v935_v56, %v468_v58  ;;  %v466_v62 = vsel %vm465_vm8, %v933_v44, %v462_v59 }
 0x148   :  { %v599_v1 = vmul.f32 %v466_v62, %v1090_v18 }
 0x149   :  { %v470_v3 = vmul.f32 0.5, %v469_v60 }
 0x14a   :  { %615 = vxpose.xlu1.b32.cont [3/16] %v599_v1, 128 }
 0x14b   :  { %v471_v5 = vsub.f32 1.5, %v470_v3  ;;  %v400_v6 = vpop.xlane.xlu2 %399 }
 0x14c   :  { %v937_v7 = vpop.eup %936  ;;  %v426_v8 = vadd.f32 1e-24, %v400_v6 }
 0x14d   :  { %v478_v9 = vmul.f32 %v937_v7, %v425_v57  ;;  %v472_v12 = vmul.f32 %v935_v56, %v471_v5  ;;  %vm484_vm12 = vweird.f32 %v937_v7 }
 0x14e   :  { %938 = vrsqrt.f32 %v426_v8  ;;  %vm485_vm14 = vmor %vm483_vm13, %vm484_vm12  ;;  %vm493_vm0 = vweird.f32 %v426_v8 }
 0x14f   :  { %v479_v14 = vmul.f32 %v937_v7, %v478_v9  ;;  %v476_v15 = vsel %vm475_vm11, %v935_v56, %v472_v12 }
 0x150   :  { %v600_v16 = vmul.f32 %v476_v15, %v1095_v25 }
 0x151   :  { %v480_v17 = vmul.f32 0.5, %v479_v14  ;;  %v1163_v20 = vpop.xlane.xlu1 %415 }
 0x152   :  { %616 = vxpose.xlu1.b32.cont [4/16] %v600_v16, 128 }
 0x153   :  { %v481_v18 = vsub.f32 1.5, %v480_v17  ;;  %v402_v21 = vpop.xlane.xlu0 %401  ;;  %v406_v23 = vpop.xlane.xlu2 %405 }
 0x154   :  { %v939_v22 = vpop.eup %938  ;;  %v427_v26 = vadd.f32 1e-24, %v402_v21  ;;  %v1165_v28 = vadd.f32 1e-24, %v406_v23 }
 0x155   :  { %v488_v24 = vmul.f32 %v939_v22, %v426_v8  ;;  %v482_v27 = vmul.f32 %v937_v7, %v481_v18  ;;  %vm494_vm15 = vweird.f32 %v939_v22 }
 0x156   :  { %940 = vrsqrt.f32 %v427_v26  ;;  %vm495_vm1 = vmor %vm493_vm0, %vm494_vm15  ;;  %vm503_vm3 = vweird.f32 %v427_v26  ;;  %vm523_vm9 = vweird.f32 %v1165_v28  ;;  %vm543_vm15 = vweird.f32 %v1174_v52 }
 0x157   :  { %v489_v0 = vmul.f32 %v939_v22, %v488_v24  ;;  %v486_v29 = vsel %vm485_vm14, %v937_v7, %v482_v27  ;;  %942 = vrsqrt.f32 %v1165_v28  ;;  %v434_v27 = vadd.f32 1e-24, %v1163_v20 }
 0x158   :  { %v601_v25 = vmul.f32 %v486_v29, %v1103_v34 }
 0x159   :  { %v490_v30 = vmul.f32 0.5, %v489_v0 }
 0x15a   :  { %617 = vxpose.xlu1.b32.cont [5/16] %v601_v25, 128 }
 0x15b   :  { %v404_v32 = vpop.xlane.xlu1 %403  ;;  %v491_v33 = vsub.f32 1.5, %v490_v30  ;;  %v412_v60 = vpop.xlane.xlu2 %411 }
 0x15c   :  { %v428_v35 = vadd.f32 1e-24, %v404_v32  ;;  %v408_v36 = vpop.xlane.xlu0 %407  ;;  %v941_v37 = vpop.eup %940  ;;  %v432_v5 = vadd.f32 1e-24, %v412_v60 }
 0x15d   :  { %v498_v38 = vmul.f32 %v941_v37, %v427_v26  ;;  %v1169_v39 = vadd.f32 1e-24, %v408_v36  ;;  %v492_v41 = vmul.f32 %v939_v22, %v491_v33  ;;  %v943_v43 = vpop.eup %942  ;;  %vm504_vm2 = vweird.f32 %v941_v37 }
 0x15e   :  { %944 = vrsqrt.f32 %v428_v35  ;;  %v518_v46 = vmul.f32 %v943_v43, %v1165_v28  ;;  %vm505_vm4 = vmor %vm503_vm3, %vm504_vm2  ;;  %vm513_vm6 = vweird.f32 %v428_v35  ;;  %vm524_vm8 = vweird.f32 %v943_v43 }
 0x15f   :  { %v499_v40 = vmul.f32 %v941_v37, %v498_v38  ;;  %v496_v44 = vsel %vm495_vm1, %v939_v22, %v492_v41  ;;  %946 = vrsqrt.f32 %v1169_v39  ;;  %vm525_vm10 = vmor %vm523_vm9, %vm524_vm8  ;;  %vm533_vm12 = vweird.f32 %v1169_v39 }
 0x160   :  { %v602_v45 = vmul.f32 %v496_v44, %v1110_v42  ;;  %v519_v54 = vmul.f32 %v943_v43, %v518_v46  ;;  %948 = vrsqrt.f32 %v1174_v52  ;;  %vm553_vm2 = vweird.f32 %v432_v5 }
 0x161   :  { %v500_v34 = vmul.f32 0.5, %v499_v40  ;;  %950 = vrsqrt.f32 %v432_v5  ;;  %vm573_vm8 = vweird.f32 %v434_v27 }
 0x162   :  { %618 = vxpose.xlu1.b32.cont [6/16] %v602_v45, 128  ;;  %v520_v59 = vmul.f32 0.5, %v519_v54 }
 0x163   :  { %v501_v47 = vsub.f32 1.5, %v500_v34 }
 0x164   :  { %v945_v48 = vpop.eup %944  ;;  %v521_v11 = vsub.f32 1.5, %v520_v59  ;;  %v414_v14 = vpop.xlane.xlu0 %413 }
 0x165   :  { %v508_v51 = vmul.f32 %v945_v48, %v428_v35  ;;  %v502_v4 = vmul.f32 %v941_v37, %v501_v47  ;;  %v947_v56 = vpop.eup %946  ;;  %vm514_vm5 = vweird.f32 %v945_v48  ;;  %v433_v16 = vadd.f32 1e-24, %v414_v14 }
 0x166   :  { %v528_v1 = vmul.f32 %v947_v56, %v1169_v39  ;;  %vm515_vm7 = vmor %vm513_vm6, %vm514_vm5  ;;  %v949_v8 = vpop.eup %948  ;;  %v522_v15 = vmul.f32 %v943_v43, %v521_v11  ;;  %vm534_vm11 = vweird.f32 %v947_v56 }
 0x167   :  { %v509_v55 = vmul.f32 %v945_v48, %v508_v51  ;;  %v506_v58 = vsel %vm505_vm4, %v941_v37, %v502_v4  ;;  %v951_v22 = vpop.eup %950  ;;  %952 = vrsqrt.f32 %v433_v16  ;;  %vm535_vm13 = vmor %vm533_vm12, %vm534_vm11  ;;  %vm544_vm14 = vweird.f32 %v949_v8 }
 0x168   :  { %v603_v42 = vmul.f32 %v506_v58, %v1121_v53  ;;  %v529_v6 = vmul.f32 %v947_v56, %v528_v1  ;;  %v538_v53 = vmul.f32 %v949_v8, %v1174_v52  ;;  %v526_v21 = vsel %vm525_vm10, %v943_v43, %v522_v15  ;;  %vm545_vm0 = vmor %vm543_vm15, %vm544_vm14 }
 0x169   :  { %v510_v57 = vmul.f32 0.5, %v509_v55  ;;  %v605_v23 = vmul.f32 %v526_v21, %v1116_v49  ;;  %v548_v24 = vmul.f32 %v951_v22, %v432_v5  ;;  %954 = vrsqrt.f32 %v434_v27  ;;  %v418_v49 = vpop.xlane.xlu2 %417 }
 0x16a   :  { %619 = vxpose.xlu1.b32.cont [7/16] %v603_v42, 128  ;;  %v530_v12 = vmul.f32 0.5, %v529_v6  ;;  %v539_v17 = vmul.f32 %v949_v8, %v538_v53  ;;  %v435_v36 = vadd.f32 1e-24, %v418_v49  ;;  %vm554_vm1 = vweird.f32 %v951_v22 }
 0x16b   :  { %v511_v62 = vsub.f32 1.5, %v510_v57  ;;  %v549_v28 = vmul.f32 %v951_v22, %v548_v24  ;;  %vm555_vm3 = vmor %vm553_vm2, %vm554_vm1  ;;  %vm563_vm5 = vweird.f32 %v433_v16 }
 0x16c   :  { %v531_v18 = vsub.f32 1.5, %v530_v12  ;;  %956 = vrsqrt.f32 %v435_v36  ;;  %v420_v43 = vpop.xlane.xlu0 %419  ;;  %vm583_vm10 = vweird.f32 %v435_v36 }
 0x16d   :  { %v512_v3 = vmul.f32 %v945_v48, %v511_v62  ;;  %v953_v25 = vpop.eup %952  ;;  %v550_v32 = vmul.f32 0.5, %v549_v28  ;;  %v436_v44 = vadd.f32 1e-24, %v420_v43 }
 0x16e   :  { %v532_v26 = vmul.f32 %v947_v56, %v531_v18  ;;  %v558_v33 = vmul.f32 %v953_v25, %v433_v16  ;;  %vm564_vm4 = vweird.f32 %v953_v25 }
 0x16f   :  { %v516_v7 = vsel %vm515_vm7, %v945_v48, %v512_v3  ;;  %v551_v37 = vsub.f32 1.5, %v550_v32  ;;  %v955_v39 = vpop.eup %954  ;;  %958 = vrsqrt.f32 %v436_v44  ;;  %vm565_vm6 = vmor %vm563_vm5, %vm564_vm4 }
 0x170   :  { %v604_v9 = vmul.f32 %v516_v7, %v1136_v2  ;;  %v540_v2 = vmul.f32 0.5, %v539_v17  ;;  %v536_v29 = vsel %vm535_vm13, %v947_v56, %v532_v26  ;;  %v559_v20 = vmul.f32 %v953_v25, %v558_v33 }
 0x171   :  { %v606_v30 = vmul.f32 %v536_v29, %v1134_v63  ;;  %v568_v41 = vmul.f32 %v955_v39, %v434_v27  ;;  %v552_v34 = vmul.f32 %v951_v22, %v551_v37  ;;  %vm574_vm7 = vweird.f32 %v955_v39 }
 0x172   :  { %620 = vxpose.xlu1.b32.cont [8/16] %v604_v9, 128  ;;  %v541_v0 = vsub.f32 1.5, %v540_v2  ;;  %v560_v63 = vmul.f32 0.5, %v559_v20  ;;  %v957_v48 = vpop.eup %956  ;;  %vm575_vm9 = vmor %vm573_vm8, %vm574_vm7  ;;  %vm593_vm13 = vweird.f32 %v436_v44 }
 0x173   :  { %v569_v45 = vmul.f32 %v955_v39, %v568_v41  ;;  %v556_v47 = vsel %vm555_vm3, %v951_v22, %v552_v34  ;;  %v578_v54 = vmul.f32 %v957_v48, %v435_v36  ;;  %vm584_vm11 = vweird.f32 %v957_v48 }
 0x174   :  { %v542_v35 = vmul.f32 %v949_v8, %v541_v0  ;;  %v561_v46 = vsub.f32 1.5, %v560_v63  ;;  %v608_v51 = vmul.f32 %v556_v47, %v1131_v61  ;;  %vm585_vm12 = vmor %vm583_vm10, %vm584_vm11 }
 0x175   :  { %v570_v52 = vmul.f32 0.5, %v569_v45  ;;  %v579_v4 = vmul.f32 %v957_v48, %v578_v54  ;;  %v959_v57 = vpop.eup %958 }
 0x176   :  { %v546_v38 = vsel %vm545_vm0, %v949_v8, %v542_v35  ;;  %v588_v59 = vmul.f32 %v959_v57, %v436_v44  ;;  %vm594_vm14 = vweird.f32 %v959_v57 }
 0x177   :  { %v607_v40 = vmul.f32 %v546_v38, %v1100_v31  ;;  %v562_v31 = vmul.f32 %v953_v25, %v561_v46  ;;  %v571_v55 = vsub.f32 1.5, %v570_v52  ;;  %v580_v42 = vmul.f32 0.5, %v579_v4  ;;  %vm595_vm15 = vmor %vm593_vm13, %vm594_vm14 }
 0x178   :  { %v589_v62 = vmul.f32 %v959_v57, %v588_v59 }
 0x179   :  { %v566_v56 = vsel %vm565_vm6, %v953_v25, %v562_v31  ;;  %v572_v60 = vmul.f32 %v955_v39, %v571_v55  ;;  %v581_v61 = vsub.f32 1.5, %v580_v42 }
 0x17a   :  { %621 = vxpose.xlu1.b32.cont [9/16] %v605_v23, 128  ;;  %v609_v58 = vmul.f32 %v566_v56, %v1148_v13  ;;  %v590_v11 = vmul.f32 0.5, %v589_v62 }
 0x17b   :  { %v576_v1 = vsel %vm575_vm9, %v955_v39, %v572_v60  ;;  %v582_v5 = vmul.f32 %v957_v48, %v581_v61 }
 0x17c   :  { %v610_v3 = vmul.f32 %v576_v1, %v1118_v50  ;;  %v591_v6 = vsub.f32 1.5, %v590_v11 }
 0x17d   :  { %v586_v13 = vsel %vm585_vm12, %v957_v48, %v582_v5 }
 0x17e   :  { %v611_v7 = vmul.f32 %v586_v13, %v1146_v10  ;;  %v592_v8 = vmul.f32 %v959_v57, %v591_v6 }
 0x180   :  { %v596_v9 = vsel %vm595_vm15, %v959_v57, %v592_v8 }
 0x181   :  { %v612_v53 = vmul.f32 %v596_v9, %v1155_v19 }
 0x182   :  { %622 = vxpose.xlu1.b32.cont [10/16] %v606_v30, 128 }
 0x18a   :  { %623 = vxpose.xlu1.b32.cont [11/16] %v607_v40, 128 }
 0x192   :  { %624 = vxpose.xlu1.b32.cont [12/16] %v608_v51, 128 }
 0x19a   :  { %625 = vxpose.xlu1.b32.cont [13/16] %v609_v58, 128 }
 0x1a2   :  { %626 = vxpose.xlu1.b32.cont [14/16] %v610_v3, 128 }
 0x1aa   :  { %627 = vxpose.xlu1.b32.cont [15/16] %v611_v7, 128 }
 0x1b2   :  { %628 = vxpose.xlu1.b32.end [16/16] %v612_v53, 128 }
 0x1de   :  { %v629_v12 = vpop.trf.xlu1 }
 0x1e6   :  { %v630_v14 = vpop.trf.xlu1 }
 0x1e7   :  { %v860_v50 = vpack.c.bf16 %v630_v14, %v629_v12 }
 0x1e9   :  { %861 = vst [vmem:[#allocation7] sm:$0xff] %v860_v50  }
 0x1ee   :  { %v631_v15 = vpop.trf.xlu1 }
 0x1f6   :  { %v632_v16 = vpop.trf.xlu1 }
 0x1f7   :  { %v865_v17 = vpack.c.bf16 %v632_v16, %v631_v15 }
 0x1f9   :  { %897 = vst [vmem:[#allocation7 + $0x8] sm:$0xff] %v865_v17  }
 0x1fe   :  { %v633_v18 = vpop.trf.xlu1 }
 0x206   :  { %v634_v21 = vpop.trf.xlu1 }
 0x207   :  { %v870_v22 = vpack.c.bf16 %v634_v21, %v633_v18 }
 0x209   :  { %898 = vst [vmem:[#allocation7 + $0x10] sm:$0xff] %v870_v22  }
 0x20e   :  { %v635_v10 = vpop.trf.xlu1 }
 0x216   :  { %v636_v23 = vpop.trf.xlu1 }
 0x217   :  { %v875_v2 = vpack.c.bf16 %v636_v23, %v635_v10 }
 0x219   :  { %899 = vst [vmem:[#allocation7 + $0x18] sm:$0xff] %v875_v2  }
 0x21e   :  { %v637_v24 = vpop.trf.xlu1 }
 0x226   :  { %v638_v26 = vpop.trf.xlu1 }
 0x227   :  { %v880_v19 = vpack.c.bf16 %v638_v26, %v637_v24 }
 0x229   :  { %900 = vst [vmem:[#allocation7 + $0x20] sm:$0xff] %v880_v19  }
 0x22e   :  { %v639_v27 = vpop.trf.xlu1 }
 0x236   :  { %v640_v0 = vpop.trf.xlu1 }
 0x237   :  { %v885_v28 = vpack.c.bf16 %v640_v0, %v639_v27 }
 0x239   :  { %901 = vst [vmem:[#allocation7 + $0x28] sm:$0xff] %v885_v28  }
 0x23e   :  { %v641_v29 = vpop.trf.xlu1 }
 0x246   :  { %v642_v25 = vpop.trf.xlu1 }
 0x247   :  { %v890_v30 = vpack.c.bf16 %v642_v25, %v641_v29 }
 0x249   :  { %902 = vst [vmem:[#allocation7 + $0x30] sm:$0xff] %v890_v30  }
 0x24e   :  { %v643_v32 = vpop.trf.xlu1 }
 0x256   :  { %v644_v49 = vpop.trf.xlu1 }
 0x257   :  { %v895_v33 = vpack.c.bf16 %v644_v49, %v643_v32 }
 0x259   :  { %903 = vst [vmem:[#allocation7 + $0x38] sm:$0xff] %v895_v33  }
 0x25a   :  { %689 = dma.vmem_to_hbm [thread:$0]  %s682_s26, 1024, %s684_s29, [#allocation4], %s1042_s24, %s1042_s24, %s1043_s25  }
 0x25b   :  { %1036 = dma.done.wait [#allocation4], 1024  }
 0x25c   :  { %1037 = vsyncadd [#allocation4], 4294966272 }
 0x25d   :  { %694 = vsyncpa [#allocation3], 1 }
 0x25e   :  { %695 = vsyncpa [#allocation6], 1 }
 0x25f   :  { %696 = vsyncpa [#allocation4], 1 }

// kernel: tpu_custom_call.1
= control target key start
LH: loop header
LB: loop body
LE: loop exit
PB: predicated region body
PF: predicated region fallthrough
CT: control target
= control target key end

     0   :  { %8 = vsyncpa [#allocation3], 0  ;;  %s1199_s0 = inlined_call_operand.hbm [shape: bf16[128,256], index: 0, kind: input, shape index: {}]   ;;  %s1200_s1 = inlined_call_operand.hbm [shape: bf16[256,128], index: 1, kind: input, shape index: {}]   ;;  %s1201_s2 = inlined_call_operand.vmem [shape: f32[1,128], index: 2, kind: input, shape index: {}]   ;;  %s1202_s3 = inlined_call_operand.hbm [shape: bf16[128,128], index: 3, kind: output, shape index: {}]  }
   0x1   :  { %9 = vsyncpa [#allocation6], 0 }
   0x2   :  { %10 = vsyncpa [#allocation4], 0  ;;  %s15_s14 = sshll.u32 %s1199_s0, 4  ;;  %s1038_s15 = smov [#allocation2]   ;;  %s16_s14 = int_to_ptr.hbm [resolvable:$true] %s15_s14 }
   0x3   :  { %s17_s16 = sshll.u32 %s1038_s15, 4  ;;  %s28_s19 = sshll.u32 %s1200_s1, 4  ;;  %s18_s16 = int_to_ptr.vmem [resolvable:$true] %s17_s16  ;;  %s29_s19 = int_to_ptr.hbm [resolvable:$true] %s28_s19 }
   0x4   :  { %s1039_s20 = smov 128   ;;  %s1040_s21 = smov 8  }
   0x5   :  { %23 = dma.hbm_to_vmem [thread:$0]  %s16_s14, 2048, %s18_s16, [#allocation3], %s1039_s20, %s1039_s20, %s1040_s21  }
   0x6   :  { %s1041_s22 = smov [#allocation5]   ;;  %s1042_s24 = smov 64  }
   0x7   :  { %s30_s23 = sshll.u32 %s1041_s22, 4  ;;  %s1043_s25 = smov 4   ;;  %s31_s23 = int_to_ptr.vmem [resolvable:$true] %s30_s23 }
   0x8   :  { %36 = dma.hbm_to_vmem [thread:$0]  %s29_s19, 2048, %s31_s23, [#allocation6], %s1042_s24, %s1042_s24, %s1043_s25  }
   0x9   :  { %1032 = dma.done.wait [#allocation3], 2048  }
   0xa   :  { %1033 = vsyncadd [#allocation3], 4294965248 }
   0xb   :  { %1034 = dma.done.wait [#allocation6], 2048  }
   0xc   :  { %1035 = vsyncadd [#allocation6], 4294965248  ;;  %v848_v0 = vld [vmem:[#allocation5 + $0x38] sm:$0xff]  ;;  %v847_v2 = vld [vmem:[#allocation5 + $0x30] sm:$0xff]  ;;  %s683_s29 = sshll.u32 %s1202_s3, 4  ;;  %s684_s29 = int_to_ptr.hbm [resolvable:$true] %s683_s29 }
   0xd   :  { %v856_v1 = vld [vmem:[#allocation5 + $0x78] sm:$0xff]  ;;  %275 = vmatpush.bf16.msra.mxu0 %v848_v0  ;;  %904 = vmatpush.bf16.msra.mxu2 %v848_v0  ;;  %v855_v3 = vld [vmem:[#allocation5 + $0x70] sm:$0xff]  ;;  %v846_v4 = vld [vmem:[#allocation5 + $0x28] sm:$0xff] }
   0xe   :  { %324 = vmatpush.bf16.msra.mxu1 %v856_v1  ;;  %912 = vmatpush.bf16.msra.mxu3 %v856_v1  ;;  %v854_v5 = vld [vmem:[#allocation5 + $0x68] sm:$0xff]  ;;  %v845_v6 = vld [vmem:[#allocation5 + $0x20] sm:$0xff]  ;;  %v844_v8 = vld [vmem:[#allocation5 + $0x18] sm:$0xff] }
   0xf   :  { %v853_v7 = vld [vmem:[#allocation5 + $0x60] sm:$0xff]  ;;  %v852_v9 = vld [vmem:[#allocation5 + $0x58] sm:$0xff]  ;;  %v843_v10 = vld [vmem:[#allocation5 + $0x10] sm:$0xff] }
  0x10   :  { %v851_v11 = vld [vmem:[#allocation5 + $0x50] sm:$0xff]  ;;  %v842_v12 = vld [vmem:[#allocation5 + $0x8] sm:$0xff]  ;;  %v841_v14 = vld [vmem:[#allocation5] sm:$0xff] }
  0x11   :  { %276 = vmatpush.bf16.msra.mxu0 %v847_v2  ;;  %905 = vmatpush.bf16.msra.mxu2 %v847_v2  ;;  %v850_v13 = vld [vmem:[#allocation5 + $0x48] sm:$0xff]  ;;  %v849_v15 = vld [vmem:[#allocation5 + $0x40] sm:$0xff]  ;;  %v707_v28 = vld [vmem:[#allocation2 + $0x10] sm:$0xf] }
  0x12   :  { %325 = vmatpush.bf16.msra.mxu1 %v855_v3  ;;  %913 = vmatpush.bf16.msra.mxu3 %v855_v3  ;;  %v699_v16 = vld [vmem:[#allocation2] sm:$0xf]  ;;  %v826_v17 = vld [vmem:[#allocation2 + $0x4] sm:$0xf0]  ;;  %v825_v20 = vld [vmem:[#allocation2 + $0x4] sm:$0xf] }
  0x13   :  { %v731_v18 = vld [vmem:[#allocation2 + $0x40] sm:$0xf]  ;;  %v834_v19 = vld [vmem:[#allocation2 + $0x44] sm:$0xf0]  ;;  %v701_v21 = vld [vmem:[#allocation2 + $0x8] sm:$0xf0]  ;;  %v700_v24 = vor.u32 %v826_v17, %v699_v16 }
  0x14   :  { %v833_v22 = vld [vmem:[#allocation2 + $0x44] sm:$0xf]  ;;  %v733_v23 = vld [vmem:[#allocation2 + $0x48] sm:$0xf0]  ;;  %v732_v25 = vor.u32 %v834_v19, %v731_v18  ;;  %v704_v26 = vor.u32 %v825_v20, %v701_v21  ;;  %v828_v29 = vld [vmem:[#allocation2 + $0x14] sm:$0xf0] }
  0x15   :  { %277 = vmatpush.bf16.msra.mxu0 %v846_v4  ;;  %906 = vmatpush.bf16.msra.mxu2 %v846_v4  ;;  %v736_v27 = vor.u32 %v833_v22, %v733_v23  ;;  %v739_v30 = vld [vmem:[#allocation2 + $0x50] sm:$0xf]  ;;  %v836_v31 = vld [vmem:[#allocation2 + $0x54] sm:$0xf0]  ;;  %v827_v32 = vld [vmem:[#allocation2 + $0x14] sm:$0xf]  ;;  %v708_v36 = vor.u32 %v828_v29, %v707_v28 }
  0x16   :  { %326 = vmatpush.bf16.msra.mxu1 %v854_v5  ;;  %914 = vmatpush.bf16.msra.mxu3 %v854_v5  ;;  %v709_v33 = vld [vmem:[#allocation2 + $0x18] sm:$0xf0]  ;;  %v835_v34 = vld [vmem:[#allocation2 + $0x54] sm:$0xf]  ;;  %v740_v37 = vor.u32 %v836_v31, %v739_v30  ;;  %v715_v40 = vld [vmem:[#allocation2 + $0x20] sm:$0xf] }
  0x17   :  { %v741_v35 = vld [vmem:[#allocation2 + $0x58] sm:$0xf0]  ;;  %v712_v38 = vor.u32 %v827_v32, %v709_v33  ;;  %v830_v41 = vld [vmem:[#allocation2 + $0x24] sm:$0xf0]  ;;  %v747_v42 = vld [vmem:[#allocation2 + $0x60] sm:$0xf] }
  0x18   :  { %v744_v39 = vor.u32 %v835_v34, %v741_v35  ;;  %v838_v43 = vld [vmem:[#allocation2 + $0x64] sm:$0xf0]  ;;  %v829_v44 = vld [vmem:[#allocation2 + $0x24] sm:$0xf]  ;;  %v717_v45 = vld [vmem:[#allocation2 + $0x28] sm:$0xf0]  ;;  %v716_v48 = vor.u32 %v830_v41, %v715_v40 }
  0x19   :  { %278 = vmatpush.bf16.msra.mxu0 %v845_v6  ;;  %907 = vmatpush.bf16.msra.mxu2 %v845_v6  ;;  %v837_v46 = vld [vmem:[#allocation2 + $0x64] sm:$0xf]  ;;  %v749_v47 = vld [vmem:[#allocation2 + $0x68] sm:$0xf0]  ;;  %v748_v49 = vor.u32 %v838_v43, %v747_v42  ;;  %v720_v50 = vor.u32 %v829_v44, %v717_v45  ;;  %v723_v52 = vld [vmem:[#allocation2 + $0x30] sm:$0xf] }
  0x1a   :  { %327 = vmatpush.bf16.msra.mxu1 %v853_v7  ;;  %915 = vmatpush.bf16.msra.mxu3 %v853_v7  ;;  %v752_v51 = vor.u32 %v837_v46, %v749_v47  ;;  %v832_v53 = vld [vmem:[#allocation2 + $0x34] sm:$0xf0]  ;;  %v831_v54 = vld [vmem:[#allocation2 + $0x34] sm:$0xf]  ;;  %v755_v55 = vld [vmem:[#allocation2 + $0x70] sm:$0xf] }
  0x1b   :  { %v840_v56 = vld [vmem:[#allocation2 + $0x74] sm:$0xf0]  ;;  %v725_v57 = vld [vmem:[#allocation2 + $0x38] sm:$0xf0]  ;;  %v839_v58 = vld [vmem:[#allocation2 + $0x74] sm:$0xf]  ;;  %v724_v60 = vor.u32 %v832_v53, %v723_v52 }
  0x1c   :  { %v757_v59 = vld [vmem:[#allocation2 + $0x78] sm:$0xf0]  ;;  %v756_v61 = vor.u32 %v840_v56, %v755_v55  ;;  %v728_v62 = vor.u32 %v831_v54, %v725_v57  ;;  %v1077_v0 = vld [vmem:[%s1201_s2] ss:$0 sm:$0xff]  ;;  %s1044_s2 = smov [#allocation7]  }
  0x1d   :  { %279 = vmatpush.bf16.msra.mxu0 %v844_v8  ;;  %908 = vmatpush.bf16.msra.mxu2 %v844_v8  ;;  %v760_v63 = vor.u32 %v839_v58, %v757_v59  ;;  %s681_s26 = sshll.u32 %s1044_s2, 4  ;;  %s682_s26 = int_to_ptr.vmem [resolvable:$true] %s681_s26 }
  0x1e   :  { %328 = vmatpush.bf16.msra.mxu1 %v852_v9  ;;  %916 = vmatpush.bf16.msra.mxu3 %v852_v9 }
  0x21   :  { %280 = vmatpush.bf16.msra.mxu0 %v843_v10  ;;  %909 = vmatpush.bf16.msra.mxu2 %v843_v10 }
  0x22   :  { %329 = vmatpush.bf16.msra.mxu1 %v851_v11  ;;  %917 = vmatpush.bf16.msra.mxu3 %v851_v11 }
  0x25   :  { %281 = vmatpush.bf16.msra.mxu0 %v842_v12  ;;  %910 = vmatpush.bf16.msra.mxu2 %v842_v12 }
  0x26   :  { %330 = vmatpush.bf16.msra.mxu1 %v850_v13  ;;  %918 = vmatpush.bf16.msra.mxu3 %v850_v13 }
  0x29   :  { %282 = vmatpush.bf16.msra.mxu0 %v841_v14  ;;  %911 = vmatpush.bf16.msra.mxu2 %v841_v14 }
  0x2a   :  { %331 = vmatpush.bf16.msra.mxu1 %v849_v15  ;;  %919 = vmatpush.bf16.msra.mxu3 %v849_v15 }
  0x2c   :  { %283 = vmatmul.bf16.vlgmr.msra.gmra.mxu0 %v700_v24  ;;  %303 = vmatmul.bf16.vlgmr.msra.gmra.mxu2 %v732_v25 }
  0x2d   :  { %332 = vmatmul.bf16.vlgmr.msra.gmra.mxu1 %v704_v26  ;;  %352 = vmatmul.bf16.vlgmr.msra.gmra.mxu3 %v736_v27 }
  0x3c   :  { %288 = vmatmul.bf16.gmra.mxu0 %v708_v36  ;;  %308 = vmatmul.bf16.gmra.mxu2 %v740_v37 }
  0x3d   :  { %337 = vmatmul.bf16.gmra.mxu1 %v712_v38  ;;  %357 = vmatmul.bf16.gmra.mxu3 %v744_v39 }
  0x4c   :  { %293 = vmatmul.bf16.gmra.mxu0 %v716_v48  ;;  %313 = vmatmul.bf16.gmra.mxu2 %v748_v49 }
  0x4d   :  { %342 = vmatmul.bf16.gmra.mxu1 %v720_v50  ;;  %362 = vmatmul.bf16.gmra.mxu3 %v752_v51 }
  0x5c   :  { %298 = vmatmul.bf16.gmra.mxu0 %v724_v60  ;;  %318 = vmatmul.bf16.gmra.mxu2 %v756_v61 }
  0x5d   :  { %347 = vmatmul.bf16.gmra.mxu1 %v728_v62  ;;  %367 = vmatmul.bf16.gmra.mxu3 %v760_v63 }
  0xa9   :  { %v284_v1 = vpop.f32.mrf.mxu0 }
  0xaa   :  { %v285_v2 = vadd.f32 %v1077_v0, %v284_v1  ;;  %v333_v3 = vpop.f32.mrf.mxu1 }
  0xac   :  { %v1080_v4 = vadd.f32 %v333_v3, %v285_v2 }
  0xae   :  { %v373_v5 = vmul.f32 %v1080_v4, %v1080_v4 }
  0xaf   :  { %v304_v6 = vpop.f32.mrf.mxu2 }
  0xb0   :  { %v353_v7 = vpop.f32.mrf.mxu3  ;;  %389 = vadd.xlane.f32.xlu0 %v373_v5  ;;  %v305_v43 = vadd.f32 %v1077_v0, %v304_v6 }
  0xb1   :  { %v286_v8 = vpop.f32.mrf.mxu0 }
  0xb2   :  { %v287_v9 = vadd.f32 %v1077_v0, %v286_v8  ;;  %v335_v10 = vpop.f32.mrf.mxu1  ;;  %v1116_v49 = vadd.f32 %v353_v7, %v305_v43 }
  0xb4   :  { %v1085_v11 = vadd.f32 %v335_v10, %v287_v9  ;;  %v381_v56 = vmul.f32 %v1116_v49, %v1116_v49 }
  0xb6   :  { %v374_v12 = vmul.f32 %v1085_v11, %v1085_v11 }
  0xb7   :  { %v306_v13 = vpop.f32.mrf.mxu2 }
  0xb8   :  { %v355_v14 = vpop.f32.mrf.mxu3  ;;  %391 = vadd.xlane.f32.xlu0 %v374_v12  ;;  %v307_v58 = vadd.f32 %v1077_v0, %v306_v13 }
  0xb9   :  { %v289_v15 = vpop.f32.mrf.mxu0 }
  0xba   :  { %v290_v16 = vadd.f32 %v1077_v0, %v289_v15  ;;  %v338_v17 = vpop.f32.mrf.mxu1  ;;  %v1134_v63 = vadd.f32 %v355_v14, %v307_v58 }
  0xbc   :  { %v1090_v18 = vadd.f32 %v338_v17, %v290_v16  ;;  %v382_v9 = vmul.f32 %v1134_v63, %v1134_v63 }
  0xbe   :  { %v375_v19 = vmul.f32 %v1090_v18, %v1090_v18 }
  0xbf   :  { %v309_v20 = vpop.f32.mrf.mxu2 }
  0xc0   :  { %v358_v21 = vpop.f32.mrf.mxu3  ;;  %393 = vadd.xlane.f32.xlu1 %v375_v19  ;;  %v310_v26 = vadd.f32 %v1077_v0, %v309_v20 }
  0xc1   :  { %v291_v22 = vpop.f32.mrf.mxu0 }
  0xc2   :  { %v292_v23 = vadd.f32 %v1077_v0, %v291_v22  ;;  %v340_v24 = vpop.f32.mrf.mxu1  ;;  %v1100_v31 = vadd.f32 %v358_v21, %v310_v26 }
  0xc4   :  { %v1095_v25 = vadd.f32 %v340_v24, %v292_v23  ;;  %v383_v36 = vmul.f32 %v1100_v31, %v1100_v31 }
  0xc6   :  { %v376_v27 = vmul.f32 %v1095_v25, %v1095_v25 }
  0xc7   :  { %v311_v28 = vpop.f32.mrf.mxu2 }
  0xc8   :  { %v360_v29 = vpop.f32.mrf.mxu3  ;;  %395 = vadd.xlane.f32.xlu1 %v376_v27  ;;  %v312_v55 = vadd.f32 %v1077_v0, %v311_v28 }
  0xc9   :  { %v294_v30 = vpop.f32.mrf.mxu0 }
  0xca   :  { %v295_v32 = vadd.f32 %v1077_v0, %v294_v30  ;;  %v343_v33 = vpop.f32.mrf.mxu1  ;;  %v1131_v61 = vadd.f32 %v360_v29, %v312_v55 }
  0xcc   :  { %v1103_v34 = vadd.f32 %v343_v33, %v295_v32  ;;  %v384_v6 = vmul.f32 %v1131_v61, %v1131_v61 }
  0xce   :  { %v377_v35 = vmul.f32 %v1103_v34, %v1103_v34 }
  0xcf   :  { %v314_v37 = vpop.f32.mrf.mxu2 }
  0xd0   :  { %v363_v38 = vpop.f32.mrf.mxu3  ;;  %397 = vadd.xlane.f32.xlu2 %v377_v35  ;;  %409 = vadd.xlane.f32.xlu1 %v383_v36  ;;  %v315_v8 = vadd.f32 %v1077_v0, %v314_v37 }
  0xd1   :  { %v296_v39 = vpop.f32.mrf.mxu0 }
  0xd2   :  { %v297_v40 = vadd.f32 %v1077_v0, %v296_v39  ;;  %v345_v41 = vpop.f32.mrf.mxu1  ;;  %v1148_v13 = vadd.f32 %v363_v38, %v315_v8 }
  0xd4   :  { %v1110_v42 = vadd.f32 %v345_v41, %v297_v40  ;;  %v385_v17 = vmul.f32 %v1148_v13, %v1148_v13 }
  0xd6   :  { %v378_v44 = vmul.f32 %v1110_v42, %v1110_v42 }
  0xd7   :  { %v316_v45 = vpop.f32.mrf.mxu2 }
  0xd8   :  { %v317_v46 = vadd.f32 %v1077_v0, %v316_v45  ;;  %399 = vadd.xlane.f32.xlu2 %v378_v44  ;;  %v365_v47 = vpop.f32.mrf.mxu3 }
  0xd9   :  { %v299_v48 = vpop.f32.mrf.mxu0 }
  0xda   :  { %v1118_v50 = vadd.f32 %v365_v47, %v317_v46  ;;  %v300_v51 = vadd.f32 %v1077_v0, %v299_v48  ;;  %v348_v52 = vpop.f32.mrf.mxu1 }
  0xdc   :  { %v1121_v53 = vadd.f32 %v348_v52, %v300_v51  ;;  %v386_v54 = vmul.f32 %v1118_v50, %v1118_v50 }
  0xde   :  { %415 = vadd.xlane.f32.xlu1 %v386_v54  ;;  %v379_v57 = vmul.f32 %v1121_v53, %v1121_v53 }
  0xdf   :  { %v319_v59 = vpop.f32.mrf.mxu2 }
  0xe0   :  { %405 = vadd.xlane.f32.xlu2 %v381_v56  ;;  %401 = vadd.xlane.f32.xlu0 %v379_v57  ;;  %v320_v3 = vadd.f32 %v1077_v0, %v319_v59  ;;  %v368_v5 = vpop.f32.mrf.mxu3 }
  0xe1   :  { %v301_v60 = vpop.f32.mrf.mxu0 }
  0xe2   :  { %v302_v62 = vadd.f32 %v1077_v0, %v301_v60  ;;  %v350_v1 = vpop.f32.mrf.mxu1  ;;  %v1146_v10 = vadd.f32 %v368_v5, %v320_v3 }
  0xe4   :  { %v1136_v2 = vadd.f32 %v350_v1, %v302_v62  ;;  %v387_v14 = vmul.f32 %v1146_v10, %v1146_v10 }
  0xe6   :  { %v380_v7 = vmul.f32 %v1136_v2, %v1136_v2 }
  0xe7   :  { %v321_v12 = vpop.f32.mrf.mxu2 }
  0xe8   :  { %411 = vadd.xlane.f32.xlu2 %v384_v6  ;;  %403 = vadd.xlane.f32.xlu1 %v380_v7  ;;  %v322_v15 = vadd.f32 %v1077_v0, %v321_v12  ;;  %v370_v16 = vpop.f32.mrf.mxu3 }
  0xe9   :  { %407 = vadd.xlane.f32.xlu0 %v382_v9 }
  0xea   :  { %v1155_v19 = vadd.f32 %v370_v16, %v322_v15 }
  0xec   :  { %v388_v20 = vmul.f32 %v1155_v19, %v1155_v19 }
  0xf0   :  { %417 = vadd.xlane.f32.xlu2 %v387_v14 }
  0xf1   :  { %413 = vadd.xlane.f32.xlu0 %v385_v17 }
  0xf9   :  { %419 = vadd.xlane.f32.xlu0 %v388_v20 }
 0x123   :  { %v390_v21 = vpop.xlane.xlu0 %389 }
 0x124   :  { %v421_v22 = vadd.f32 1e-24, %v390_v21 }
 0x126   :  { %928 = vrsqrt.f32 %v421_v22  ;;  %vm443_vm1 = vweird.f32 %v421_v22 }
 0x12b   :  { %v392_v23 = vpop.xlane.xlu0 %391 }
 0x12c   :  { %v929_v24 = vpop.eup %928  ;;  %v422_v26 = vadd.f32 1e-24, %v392_v23 }
 0x12d   :  { %v438_v27 = vmul.f32 %v929_v24, %v421_v22  ;;  %vm444_vm0 = vweird.f32 %v929_v24 }
 0x12e   :  { %930 = vrsqrt.f32 %v422_v26  ;;  %vm445_vm2 = vmor %vm443_vm1, %vm444_vm0  ;;  %vm453_vm4 = vweird.f32 %v422_v26 }
 0x12f   :  { %v439_v0 = vmul.f32 %v929_v24, %v438_v27 }
 0x131   :  { %v440_v28 = vmul.f32 0.5, %v439_v0 }
 0x133   :  { %v441_v29 = vsub.f32 1.5, %v440_v28  ;;  %v394_v30 = vpop.xlane.xlu1 %393 }
 0x134   :  { %v931_v32 = vpop.eup %930  ;;  %v423_v33 = vadd.f32 1e-24, %v394_v30 }
 0x135   :  { %v448_v35 = vmul.f32 %v931_v32, %v422_v26  ;;  %v442_v36 = vmul.f32 %v929_v24, %v441_v29  ;;  %vm454_vm3 = vweird.f32 %v931_v32 }
 0x136   :  { %932 = vrsqrt.f32 %v423_v33  ;;  %vm455_vm5 = vmor %vm453_vm4, %vm454_vm3  ;;  %vm463_vm7 = vweird.f32 %v423_v33 }
 0x137   :  { %v449_v37 = vmul.f32 %v931_v32, %v448_v35  ;;  %v446_v38 = vsel %vm445_vm2, %v929_v24, %v442_v36 }
 0x138   :  { %v597_v39 = vmul.f32 %v446_v38, %v1080_v4 }
 0x139   :  { %v450_v40 = vmul.f32 0.5, %v449_v37 }
 0x13a   :  { %613 = vxpose.xlu1.b32.start [1/16] %v597_v39, 128 }
 0x13b   :  { %v451_v41 = vsub.f32 1.5, %v450_v40  ;;  %v396_v43 = vpop.xlane.xlu1 %395 }
 0x13c   :  { %v933_v44 = vpop.eup %932  ;;  %v424_v45 = vadd.f32 1e-24, %v396_v43 }
 0x13d   :  { %v458_v46 = vmul.f32 %v933_v44, %v423_v33  ;;  %v452_v47 = vmul.f32 %v931_v32, %v451_v41  ;;  %vm464_vm6 = vweird.f32 %v933_v44 }
 0x13e   :  { %934 = vrsqrt.f32 %v424_v45  ;;  %vm465_vm8 = vmor %vm463_vm7, %vm464_vm6  ;;  %vm473_vm10 = vweird.f32 %v424_v45 }
 0x13f   :  { %v459_v48 = vmul.f32 %v933_v44, %v458_v46  ;;  %v456_v51 = vsel %vm455_vm5, %v931_v32, %v452_v47 }
 0x140   :  { %v598_v52 = vmul.f32 %v456_v51, %v1085_v11 }
 0x141   :  { %v460_v54 = vmul.f32 0.5, %v459_v48 }
 0x142   :  { %614 = vxpose.xlu1.b32.cont [2/16] %v598_v52, 128 }
 0x143   :  { %v461_v55 = vsub.f32 1.5, %v460_v54  ;;  %v398_v4 = vpop.xlane.xlu2 %397  ;;  %v410_v11 = vpop.xlane.xlu1 %409 }
 0x144   :  { %v935_v56 = vpop.eup %934  ;;  %v425_v57 = vadd.f32 1e-24, %v398_v4  ;;  %v1174_v52 = vadd.f32 1e-24, %v410_v11 }
 0x145   :  { %v468_v58 = vmul.f32 %v935_v56, %v424_v45  ;;  %v462_v59 = vmul.f32 %v933_v44, %v461_v55  ;;  %vm474_vm9 = vweird.f32 %v935_v56 }
 0x146   :  { %936 = vrsqrt.f32 %v425_v57  ;;  %vm475_vm11 = vmor %vm473_vm10, %vm474_vm9  ;;  %vm483_vm13 = vweird.f32 %v425_v57 }
 0x147   :  { %v469_v60 = vmul.f32 %v935_v56, %v468_v58  ;;  %v466_v62 = vsel %vm465_vm8, %v933_v44, %v462_v59 }
 0x148   :  { %v599_v1 = vmul.f32 %v466_v62, %v1090_v18 }
 0x149   :  { %v470_v3 = vmul.f32 0.5, %v469_v60 }
 0x14a   :  { %615 = vxpose.xlu1.b32.cont [3/16] %v599_v1, 128 }
 0x14b   :  { %v471_v5 = vsub.f32 1.5, %v470_v3  ;;  %v400_v6 = vpop.xlane.xlu2 %399 }
 0x14c   :  { %v937_v7 = vpop.eup %936  ;;  %v426_v8 = vadd.f32 1e-24, %v400_v6 }
 0x14d   :  { %v478_v9 = vmul.f32 %v937_v7, %v425_v57  ;;  %v472_v12 = vmul.f32 %v935_v56, %v471_v5  ;;  %vm484_vm12 = vweird.f32 %v937_v7 }
 0x14e   :  { %938 = vrsqrt.f32 %v426_v8  ;;  %vm485_vm14 = vmor %vm483_vm13, %vm484_vm12  ;;  %vm493_vm0 = vweird.f32 %v426_v8 }
 0x14f   :  { %v479_v14 = vmul.f32 %v937_v7, %v478_v9  ;;  %v476_v15 = vsel %vm475_vm11, %v935_v56, %v472_v12 }
 0x150   :  { %v600_v16 = vmul.f32 %v476_v15, %v1095_v25 }
 0x151   :  { %v480_v17 = vmul.f32 0.5, %v479_v14  ;;  %v1163_v20 = vpop.xlane.xlu1 %415 }
 0x152   :  { %616 = vxpose.xlu1.b32.cont [4/16] %v600_v16, 128 }
 0x153   :  { %v481_v18 = vsub.f32 1.5, %v480_v17  ;;  %v402_v21 = vpop.xlane.xlu0 %401  ;;  %v406_v23 = vpop.xlane.xlu2 %405 }
 0x154   :  { %v939_v22 = vpop.eup %938  ;;  %v427_v26 = vadd.f32 1e-24, %v402_v21  ;;  %v1165_v28 = vadd.f32 1e-24, %v406_v23 }
 0x155   :  { %v488_v24 = vmul.f32 %v939_v22, %v426_v8  ;;  %v482_v27 = vmul.f32 %v937_v7, %v481_v18  ;;  %vm494_vm15 = vweird.f32 %v939_v22 }
 0x156   :  { %940 = vrsqrt.f32 %v427_v26  ;;  %vm495_vm1 = vmor %vm493_vm0, %vm494_vm15  ;;  %vm503_vm3 = vweird.f32 %v427_v26  ;;  %vm523_vm9 = vweird.f32 %v1165_v28  ;;  %vm543_vm15 = vweird.f32 %v1174_v52 }
 0x157   :  { %v489_v0 = vmul.f32 %v939_v22, %v488_v24  ;;  %v486_v29 = vsel %vm485_vm14, %v937_v7, %v482_v27  ;;  %942 = vrsqrt.f32 %v1165_v28  ;;  %v434_v27 = vadd.f32 1e-24, %v1163_v20 }
 0x158   :  { %v601_v25 = vmul.f32 %v486_v29, %v1103_v34 }
 0x159   :  { %v490_v30 = vmul.f32 0.5, %v489_v0 }
 0x15a   :  { %617 = vxpose.xlu1.b32.cont [5/16] %v601_v25, 128 }
 0x15b   :  { %v404_v32 = vpop.xlane.xlu1 %403  ;;  %v491_v33 = vsub.f32 1.5, %v490_v30  ;;  %v412_v60 = vpop.xlane.xlu2 %411 }
 0x15c   :  { %v428_v35 = vadd.f32 1e-24, %v404_v32  ;;  %v408_v36 = vpop.xlane.xlu0 %407  ;;  %v941_v37 = vpop.eup %940  ;;  %v432_v5 = vadd.f32 1e-24, %v412_v60 }
 0x15d   :  { %v498_v38 = vmul.f32 %v941_v37, %v427_v26  ;;  %v1169_v39 = vadd.f32 1e-24, %v408_v36  ;;  %v492_v41 = vmul.f32 %v939_v22, %v491_v33  ;;  %v943_v43 = vpop.eup %942  ;;  %vm504_vm2 = vweird.f32 %v941_v37 }
 0x15e   :  { %944 = vrsqrt.f32 %v428_v35  ;;  %v518_v46 = vmul.f32 %v943_v43, %v1165_v28  ;;  %vm505_vm4 = vmor %vm503_vm3, %vm504_vm2  ;;  %vm513_vm6 = vweird.f32 %v428_v35  ;;  %vm524_vm8 = vweird.f32 %v943_v43 }
 0x15f   :  { %v499_v40 = vmul.f32 %v941_v37, %v498_v38  ;;  %v496_v44 = vsel %vm495_vm1, %v939_v22, %v492_v41  ;;  %946 = vrsqrt.f32 %v1169_v39  ;;  %vm525_vm10 = vmor %vm523_vm9, %vm524_vm8  ;;  %vm533_vm12 = vweird.f32 %v1169_v39 }
 0x160   :  { %v602_v45 = vmul.f32 %v496_v44, %v1110_v42  ;;  %v519_v54 = vmul.f32 %v943_v43, %v518_v46  ;;  %948 = vrsqrt.f32 %v1174_v52  ;;  %vm553_vm2 = vweird.f32 %v432_v5 }
 0x161   :  { %v500_v34 = vmul.f32 0.5, %v499_v40  ;;  %950 = vrsqrt.f32 %v432_v5  ;;  %vm573_vm8 = vweird.f32 %v434_v27 }
 0x162   :  { %618 = vxpose.xlu1.b32.cont [6/16] %v602_v45, 128  ;;  %v520_v59 = vmul.f32 0.5, %v519_v54 }
 0x163   :  { %v501_v47 = vsub.f32 1.5, %v500_v34 }
 0x164   :  { %v945_v48 = vpop.eup %944  ;;  %v521_v11 = vsub.f32 1.5, %v520_v59  ;;  %v414_v14 = vpop.xlane.xlu0 %413 }
 0x165   :  { %v508_v51 = vmul.f32 %v945_v48, %v428_v35  ;;  %v502_v4 = vmul.f32 %v941_v37, %v501_v47  ;;  %v947_v56 = vpop.eup %946  ;;  %vm514_vm5 = vweird.f32 %v945_v48  ;;  %v433_v16 = vadd.f32 1e-24, %v414_v14 }
 0x166   :  { %v528_v1 = vmul.f32 %v947_v56, %v1169_v39  ;;  %vm515_vm7 = vmor %vm513_vm6, %vm514_vm5  ;;  %v949_v8 = vpop.eup %948  ;;  %v522_v15 = vmul.f32 %v943_v43, %v521_v11  ;;  %vm534_vm11 = vweird.f32 %v947_v56 }
 0x167   :  { %v509_v55 = vmul.f32 %v945_v48, %v508_v51  ;;  %v506_v58 = vsel %vm505_vm4, %v941_v37, %v502_v4  ;;  %v951_v22 = vpop.eup %950  ;;  %952 = vrsqrt.f32 %v433_v16  ;;  %vm535_vm13 = vmor %vm533_vm12, %vm534_vm11  ;;  %vm544_vm14 = vweird.f32 %v949_v8 }
 0x168   :  { %v603_v42 = vmul.f32 %v506_v58, %v1121_v53  ;;  %v529_v6 = vmul.f32 %v947_v56, %v528_v1  ;;  %v538_v53 = vmul.f32 %v949_v8, %v1174_v52  ;;  %v526_v21 = vsel %vm525_vm10, %v943_v43, %v522_v15  ;;  %vm545_vm0 = vmor %vm543_vm15, %vm544_vm14 }
 0x169   :  { %v510_v57 = vmul.f32 0.5, %v509_v55  ;;  %v605_v23 = vmul.f32 %v526_v21, %v1116_v49  ;;  %v548_v24 = vmul.f32 %v951_v22, %v432_v5  ;;  %954 = vrsqrt.f32 %v434_v27  ;;  %v418_v49 = vpop.xlane.xlu2 %417 }
 0x16a   :  { %619 = vxpose.xlu1.b32.cont [7/16] %v603_v42, 128  ;;  %v530_v12 = vmul.f32 0.5, %v529_v6  ;;  %v539_v17 = vmul.f32 %v949_v8, %v538_v53  ;;  %v435_v36 = vadd.f32 1e-24, %v418_v49  ;;  %vm554_vm1 = vweird.f32 %v951_v22 }
 0x16b   :  { %v511_v62 = vsub.f32 1.5, %v510_v57  ;;  %v549_v28 = vmul.f32 %v951_v22, %v548_v24  ;;  %vm555_vm3 = vmor %vm553_vm2, %vm554_vm1  ;;  %vm563_vm5 = vweird.f32 %v433_v16 }
 0x16c   :  { %v531_v18 = vsub.f32 1.5, %v530_v12  ;;  %956 = vrsqrt.f32 %v435_v36  ;;  %v420_v43 = vpop.xlane.xlu0 %419  ;;  %vm583_vm10 = vweird.f32 %v435_v36 }
 0x16d   :  { %v512_v3 = vmul.f32 %v945_v48, %v511_v62  ;;  %v953_v25 = vpop.eup %952  ;;  %v550_v32 = vmul.f32 0.5, %v549_v28  ;;  %v436_v44 = vadd.f32 1e-24, %v420_v43 }
 0x16e   :  { %v532_v26 = vmul.f32 %v947_v56, %v531_v18  ;;  %v558_v33 = vmul.f32 %v953_v25, %v433_v16  ;;  %vm564_vm4 = vweird.f32 %v953_v25 }
 0x16f   :  { %v516_v7 = vsel %vm515_vm7, %v945_v48, %v512_v3  ;;  %v551_v37 = vsub.f32 1.5, %v550_v32  ;;  %v955_v39 = vpop.eup %954  ;;  %958 = vrsqrt.f32 %v436_v44  ;;  %vm565_vm6 = vmor %vm563_vm5, %vm564_vm4 }
 0x170   :  { %v604_v9 = vmul.f32 %v516_v7, %v1136_v2  ;;  %v540_v2 = vmul.f32 0.5, %v539_v17  ;;  %v536_v29 = vsel %vm535_vm13, %v947_v56, %v532_v26  ;;  %v559_v20 = vmul.f32 %v953_v25, %v558_v33 }
 0x171   :  { %v606_v30 = vmul.f32 %v536_v29, %v1134_v63  ;;  %v568_v41 = vmul.f32 %v955_v39, %v434_v27  ;;  %v552_v34 = vmul.f32 %v951_v22, %v551_v37  ;;  %vm574_vm7 = vweird.f32 %v955_v39 }
 0x172   :  { %620 = vxpose.xlu1.b32.cont [8/16] %v604_v9, 128  ;;  %v541_v0 = vsub.f32 1.5, %v540_v2  ;;  %v560_v63 = vmul.f32 0.5, %v559_v20  ;;  %v957_v48 = vpop.eup %956  ;;  %vm575_vm9 = vmor %vm573_vm8, %vm574_vm7  ;;  %vm593_vm13 = vweird.f32 %v436_v44 }
 0x173   :  { %v569_v45 = vmul.f32 %v955_v39, %v568_v41  ;;  %v556_v47 = vsel %vm555_vm3, %v951_v22, %v552_v34  ;;  %v578_v54 = vmul.f32 %v957_v48, %v435_v36  ;;  %vm584_vm11 = vweird.f32 %v957_v48 }
 0x174   :  { %v542_v35 = vmul.f32 %v949_v8, %v541_v0  ;;  %v561_v46 = vsub.f32 1.5, %v560_v63  ;;  %v608_v51 = vmul.f32 %v556_v47, %v1131_v61  ;;  %vm585_vm12 = vmor %vm583_vm10, %vm584_vm11 }
 0x175   :  { %v570_v52 = vmul.f32 0.5, %v569_v45  ;;  %v579_v4 = vmul.f32 %v957_v48, %v578_v54  ;;  %v959_v57 = vpop.eup %958 }
 0x176   :  { %v546_v38 = vsel %vm545_vm0, %v949_v8, %v542_v35  ;;  %v588_v59 = vmul.f32 %v959_v57, %v436_v44  ;;  %vm594_vm14 = vweird.f32 %v959_v57 }
 0x177   :  { %v607_v40 = vmul.f32 %v546_v38, %v1100_v31  ;;  %v562_v31 = vmul.f32 %v953_v25, %v561_v46  ;;  %v571_v55 = vsub.f32 1.5, %v570_v52  ;;  %v580_v42 = vmul.f32 0.5, %v579_v4  ;;  %vm595_vm15 = vmor %vm593_vm13, %vm594_vm14 }
 0x178   :  { %v589_v62 = vmul.f32 %v959_v57, %v588_v59 }
 0x179   :  { %v566_v56 = vsel %vm565_vm6, %v953_v25, %v562_v31  ;;  %v572_v60 = vmul.f32 %v955_v39, %v571_v55  ;;  %v581_v61 = vsub.f32 1.5, %v580_v42 }
 0x17a   :  { %621 = vxpose.xlu1.b32.cont [9/16] %v605_v23, 128  ;;  %v609_v58 = vmul.f32 %v566_v56, %v1148_v13  ;;  %v590_v11 = vmul.f32 0.5, %v589_v62 }
 0x17b   :  { %v576_v1 = vsel %vm575_vm9, %v955_v39, %v572_v60  ;;  %v582_v5 = vmul.f32 %v957_v48, %v581_v61 }
 0x17c   :  { %v610_v3 = vmul.f32 %v576_v1, %v1118_v50  ;;  %v591_v6 = vsub.f32 1.5, %v590_v11 }
 0x17d   :  { %v586_v13 = vsel %vm585_vm12, %v957_v48, %v582_v5 }
 0x17e   :  { %v611_v7 = vmul.f32 %v586_v13, %v1146_v10  ;;  %v592_v8 = vmul.f32 %v959_v57, %v591_v6 }
 0x180   :  { %v596_v9 = vsel %vm595_vm15, %v959_v57, %v592_v8 }
 0x181   :  { %v612_v53 = vmul.f32 %v596_v9, %v1155_v19 }
 0x182   :  { %622 = vxpose.xlu1.b32.cont [10/16] %v606_v30, 128 }
 0x18a   :  { %623 = vxpose.xlu1.b32.cont [11/16] %v607_v40, 128 }
 0x192   :  { %624 = vxpose.xlu1.b32.cont [12/16] %v608_v51, 128 }
 0x19a   :  { %625 = vxpose.xlu1.b32.cont [13/16] %v609_v58, 128 }
 0x1a2   :  { %626 = vxpose.xlu1.b32.cont [14/16] %v610_v3, 128 }
 0x1aa   :  { %627 = vxpose.xlu1.b32.cont [15/16] %v611_v7, 128 }
 0x1b2   :  { %628 = vxpose.xlu1.b32.end [16/16] %v612_v53, 128 }
 0x1de   :  { %v629_v12 = vpop.trf.xlu1 }
 0x1e6   :  { %v630_v14 = vpop.trf.xlu1 }
 0x1e7   :  { %v860_v50 = vpack.c.bf16 %v630_v14, %v629_v12 }
 0x1e9   :  { %861 = vst [vmem:[#allocation7] sm:$0xff] %v860_v50  }
 0x1ee   :  { %v631_v15 = vpop.trf.xlu1 }
 0x1f6   :  { %v632_v16 = vpop.trf.xlu1 }
 0x1f7   :  { %v865_v17 = vpack.c.bf16 %v632_v16, %v631_v15 }
 0x1f9   :  { %897 = vst [vmem:[#allocation7 + $0x8] sm:$0xff] %v865_v17  }
 0x1fe   :  { %v633_v18 = vpop.trf.xlu1 }
 0x206   :  { %v634_v21 = vpop.trf.xlu1 }
 0x207   :  { %v870_v22 = vpack.c.bf16 %v634_v21, %v633_v18 }
 0x209   :  { %898 = vst [vmem:[#allocation7 + $0x10] sm:$0xff] %v870_v22  }
 0x20e   :  { %v635_v10 = vpop.trf.xlu1 }
 0x216   :  { %v636_v23 = vpop.trf.xlu1 }
 0x217   :  { %v875_v2 = vpack.c.bf16 %v636_v23, %v635_v10 }
 0x219   :  { %899 = vst [vmem:[#allocation7 + $0x18] sm:$0xff] %v875_v2  }
 0x21e   :  { %v637_v24 = vpop.trf.xlu1 }
 0x226   :  { %v638_v26 = vpop.trf.xlu1 }
 0x227   :  { %v880_v19 = vpack.c.bf16 %v638_v26, %v637_v24 }
 0x229   :  { %900 = vst [vmem:[#allocation7 + $0x20] sm:$0xff] %v880_v19  }
 0x22e   :  { %v639_v27 = vpop.trf.xlu1 }
 0x236   :  { %v640_v0 = vpop.trf.xlu1 }
 0x237   :  { %v885_v28 = vpack.c.bf16 %v640_v0, %v639_v27 }
 0x239   :  { %901 = vst [vmem:[#allocation7 + $0x28] sm:$0xff] %v885_v28  }
 0x23e   :  { %v641_v29 = vpop.trf.xlu1 }
 0x246   :  { %v642_v25 = vpop.trf.xlu1 }
 0x247   :  { %v890_v30 = vpack.c.bf16 %v642_v25, %v641_v29 }
 0x249   :  { %902 = vst [vmem:[#allocation7 + $0x30] sm:$0xff] %v890_v30  }
 0x24e   :  { %v643_v32 = vpop.trf.xlu1 }
 0x256   :  { %v644_v49 = vpop.trf.xlu1 }
 0x257   :  { %v895_v33 = vpack.c.bf16 %v644_v49, %v643_v32 }
 0x259   :  { %903 = vst [vmem:[#allocation7 + $0x38] sm:$0xff] %v895_v33  }
 0x25a   :  { %689 = dma.vmem_to_hbm [thread:$0]  %s682_s26, 1024, %s684_s29, [#allocation4], %s1042_s24, %s1042_s24, %s1043_s25  }
 0x25b   :  { %1036 = dma.done.wait [#allocation4], 1024  }
 0x25c   :  { %1037 = vsyncadd [#allocation4], 4294966272 }
 0x25d   :  { %694 = vsyncpa [#allocation3], 1 }
 0x25e   :  { %695 = vsyncpa [#allocation6], 1 }
 0x25f   :  { %696 = vsyncpa [#allocation4], 1 }

</bundles_post_ra>
